<compile_context>
chip_gen: v7x
topology: tpu7x:2x2x1
jax: 0.10.0
libtpu: 0.0.40
codegen_flags: <defaults>
</compile_context>

<pallas_src>
import functools
import math

import jax
import jax.numpy as jnp
from jax import lax
from jax.experimental import pallas as pl
from jax.experimental.pallas import tpu as pltpu


CFG = dict(
    vocab_size=128,
    hidden_size=32,
    num_layers=2,
    num_heads=4,
    intermediate_size=64,
    max_position=16,
    type_vocab_size=2,
    num_classes=3,
)


# ------------------------------ fused Pallas kernel ------------------------------

def _bert_fused_kernel(
    emb_ref, mask_ref, emb_ln_g_ref, emb_ln_b_ref,
    w_qkv_ref, b_qkv_ref, w_o_ref, b_o_ref, ln1_g_ref, ln1_b_ref,
    w1_ref, b1_ref, w2_ref, b2_ref, ln2_g_ref, ln2_b_ref,
    pooler_w_ref, pooler_b_ref, fc_w_ref, fc_b_ref,
    out_ref, ctx_ref, *, num_layers, num_heads, seq_len, eps):
    """One grid step == TB sequences: emb_ref is (TB*S, H), out_ref is (1, TB, Cpad)."""
    R, H = emb_ref.shape                       # R = TB * S rows in this block
    TB = R // seq_len
    dH = H // num_heads
    scale = 1.0 / math.sqrt(dH)

    def ln(v, g, b):
        mu = jnp.mean(v, axis=-1, keepdims=True)
        vc = v - mu
        var = jnp.mean(vc * vc, axis=-1, keepdims=True)
        return vc * lax.rsqrt(var + eps) * g + b

    def mm(a, w_bf16):
        # activations cast to bf16 at the MXU boundary; weights arrive pre-cast bf16.
        return jnp.dot(a.astype(jnp.bfloat16), w_bf16,
                       preferred_element_type=jnp.float32)

    # ---- embedding LayerNorm ----
    x = ln(emb_ref[...], emb_ln_g_ref[...], emb_ln_b_ref[...])        # (R, H) f32

    # ---- additive attention bias, built ONCE (block-diagonal & key-unmasked) ----
    ri = lax.broadcasted_iota(jnp.int32, (R, R), 0)
    ci = lax.broadcasted_iota(jnp.int32, (R, R), 1)
    same = jnp.zeros((R, R), jnp.bool_)
    for t in range(TB):                         # static loop; no integer division
        lo, hi = t * seq_len, (t + 1) * seq_len
        same = same | ((ri >= lo) & (ri < hi) & (ci >= lo) & (ci < hi))
    keep = same & (mask_ref[...].reshape(1, R) > 0.0)   # single (1,R)->(R,R) broadcast
    bias = jnp.where(keep, 0.0, -1e9).astype(jnp.float32)             # (R, R)

    # ---- L encoder layers, weights indexed from stacked [L, ...] refs ----
    def layer_body(l, x):
        # fused QKV projection: one MXU pass with N = 3H
        qkv = mm(x, w_qkv_ref[l]) + b_qkv_ref[l]                       # (R, 3H) f32
        q_bf = qkv[:, :H].astype(jnp.bfloat16)
        k_t_bf = qkv[:, H:2 * H].T.astype(jnp.bfloat16)                # ONE transpose / layer -> (H, R)
        v_bf = qkv[:, 2 * H:].astype(jnp.bfloat16)

        # per-head attention; contexts accumulated into a (R, H) VMEM slab so the
        # output projection is a single (R,H)@(H,H) matmul per layer.
        for h in range(num_heads):
            qh = q_bf[:, h * dH:(h + 1) * dH]                          # (R, dH)
            kh_t = k_t_bf[h * dH:(h + 1) * dH, :]                      # (dH, R)
            s = jnp.dot(qh, kh_t, preferred_element_type=jnp.float32) * scale + bias
            s = s - jnp.max(s, axis=-1, keepdims=True)
            p = jnp.exp(s)
            inv = pl.reciprocal(jnp.sum(p, axis=-1, keepdims=True), approx=True)  # EUP
            p = p * inv
            ctx = jnp.dot(p.astype(jnp.bfloat16), v_bf[:, h * dH:(h + 1) * dH],
                          preferred_element_type=jnp.float32)          # (R, dH)
            ctx_ref[:, h * dH:(h + 1) * dH] = ctx                      # static lane offsets

        attn = mm(ctx_ref[...], w_o_ref[l]) + b_o_ref[l]               # (R, H)
        x = ln(attn + x, ln1_g_ref[l], ln1_b_ref[l])

        h1 = mm(x, w1_ref[l]) + b1_ref[l]                              # (R, I)
        # TODO(synk): HF BERT uses exact erf-GELU; tanh approximation used here.
        h1 = jax.nn.gelu(h1, approximate=True)
        h2 = mm(h1, w2_ref[l]) + b2_ref[l]                             # (R, H)
        return ln(h2 + x, ln2_g_ref[l], ln2_b_ref[l])

    x = lax.fori_loop(0, num_layers, layer_body, x, unroll=True)

    # ---- pooler over all TB [CLS] rows + dropout(eval)=identity + fc ----
    cls = jnp.concatenate([x[t * seq_len:t * seq_len + 1, :] for t in range(TB)],
                          axis=0)                                      # (TB, H)
    pooled = jnp.tanh(mm(cls, pooler_w_ref[...]) + pooler_b_ref[...])  # (TB, H)
    logits = mm(pooled, fc_w_ref[...]) + fc_b_ref[...]                 # (TB, Cpad) lane-dense
    out_ref[...] = logits.reshape(out_ref.shape).astype(out_ref.dtype)


# ------------------------------ model / params ------------------------------

def init_params(key, cfg):
    H = cfg["hidden_size"]
    I = cfg["intermediate_size"]
    L = cfg["num_layers"]
    C = cfg["num_classes"]

    def normal(k, shape, std):
        return std * jax.random.normal(k, shape, dtype=jnp.float32)

    ks = iter(jax.random.split(key, 64))
    return {
        "word_emb": normal(next(ks), (cfg["vocab_size"], H), 0.02),
        "pos_emb": normal(next(ks), (cfg["max_position"], H), 0.02),
        "type_emb": normal(next(ks), (cfg["type_vocab_size"], H), 0.02),
        "emb_ln_g": jnp.ones((1, H), jnp.float32),
        "emb_ln_b": jnp.zeros((1, H), jnp.float32),
        # per-layer weights stacked along a leading L axis (kernel indexes [l])
        "w_qkv": normal(next(ks), (L, H, 3 * H), 0.02),
        "b_qkv": jnp.zeros((L, 1, 3 * H), jnp.float32),
        "w_o": normal(next(ks), (L, H, H), 0.02),
        "b_o": jnp.zeros((L, 1, H), jnp.float32),
        "ln1_g": jnp.ones((L, 1, H), jnp.float32),
        "ln1_b": jnp.zeros((L, 1, H), jnp.float32),
        "w1": normal(next(ks), (L, H, I), 0.02),
        "b1": jnp.zeros((L, 1, I), jnp.float32),
        "w2": normal(next(ks), (L, I, H), 0.02),
        "b2": jnp.zeros((L, 1, H), jnp.float32),
        "ln2_g": jnp.ones((L, 1, H), jnp.float32),
        "ln2_b": jnp.zeros((L, 1, H), jnp.float32),
        "pooler_w": normal(next(ks), (H, H), 0.02),
        "pooler_b": jnp.zeros((1, H), jnp.float32),
        # fc: nn.init.normal_(weight, std=0.2), bias = 0
        "fc_w": normal(next(ks), (H, C), 0.2),
        "fc_b": jnp.zeros((1, C), jnp.float32),
    }


def bert_classifier_forward(params, input_ids, attention_mask, token_type_ids):
    cfg = CFG
    B, S = input_ids.shape
    H = cfg["hidden_size"]
    L = cfg["num_layers"]
    I = cfg["intermediate_size"]
    C = cfg["num_classes"]
    nH = cfg["num_heads"]

    # Sequences per grid step: target ~128 sublane rows per block; on v7x keep the
    # resulting grid length a multiple of 2 when B allows so both TCs get work.
    TB = max(1, min(B, max(1, 128 // S)))
    nblk = pl.cdiv(B, TB)
    B_pad = nblk * TB
    R = TB * S
    C_pad = 128                      # lane-dense logits store; sliced back to C outside

    # ---- embedding gathers (plain-JAX glue) ----
    pos = jnp.arange(S)
    emb = (params["word_emb"][input_ids]
           + params["pos_emb"][pos][None, :, :]
           + params["type_emb"][token_type_ids]).astype(jnp.float32)   # (B, S, H)
    mask = attention_mask.astype(jnp.float32)                          # (B, S)
    if B_pad != B:
        emb = jnp.concatenate(
            [emb, jnp.zeros((B_pad - B, S, H), jnp.float32)], axis=0)
        mask = jnp.concatenate(
            [mask, jnp.ones((B_pad - B, S), jnp.float32)], axis=0)
    emb = emb.reshape(B_pad * S, H)
    mask = mask.reshape(nblk, 1, R)

    # ---- pre-cast matmul weights to bf16 once; pad fc to 128 lanes ----
    bf = lambda w: w.astype(jnp.bfloat16)
    w_qkv = bf(params["w_qkv"])
    w_o = bf(params["w_o"])
    w1 = bf(params["w1"])
    w2 = bf(params["w2"])
    pooler_w = bf(params["pooler_w"])
    fc_w = bf(jnp.pad(params["fc_w"], ((0, 0), (0, C_pad - C))))
    fc_b = jnp.pad(params["fc_b"], ((0, 0), (0, C_pad - C)))

    const2 = lambda b: (0, 0)
    const3 = lambda b: (0, 0, 0)

    kernel = functools.partial(_bert_fused_kernel,
                               num_layers=L, num_heads=nH, seq_len=S, eps=1e-12)

    logits = pl.pallas_call(
        kernel,
        out_shape=jax.ShapeDtypeStruct((nblk, TB, C_pad), jnp.float32),
        grid=(nblk,),
        in_specs=[
            pl.BlockSpec((R, H), lambda b: (b, 0)),        # TB sequences of embeddings
            pl.BlockSpec((1, 1, R), lambda b: (b, 0, 0)),  # raw key mask for the block
            pl.BlockSpec((1, H), const2),                  # emb_ln_g
            pl.BlockSpec((1, H), const2),                  # emb_ln_b
            pl.BlockSpec((L, H, 3 * H), const3),           # w_qkv (stacked, bf16)
            pl.BlockSpec((L, 1, 3 * H), const3),           # b_qkv
            pl.BlockSpec((L, H, H), const3),               # w_o (bf16)
            pl.BlockSpec((L, 1, H), const3),               # b_o
            pl.BlockSpec((L, 1, H), const3),               # ln1_g
            pl.BlockSpec((L, 1, H), const3),               # ln1_b
            pl.BlockSpec((L, H, I), const3),               # w1 (bf16)
            pl.BlockSpec((L, 1, I), const3),               # b1
            pl.BlockSpec((L, I, H), const3),               # w2 (bf16)
            pl.BlockSpec((L, 1, H), const3),               # b2
            pl.BlockSpec((L, 1, H), const3),               # ln2_g
            pl.BlockSpec((L, 1, H), const3),               # ln2_b
            pl.BlockSpec((H, H), const2),                  # pooler_w (bf16)
            pl.BlockSpec((1, H), const2),                  # pooler_b
            pl.BlockSpec((H, C_pad), const2),              # fc_w (bf16, lane-padded)
            pl.BlockSpec((1, C_pad), const2),              # fc_b (lane-padded)
        ],
        out_specs=pl.BlockSpec((1, TB, C_pad), lambda b: (b, 0, 0)),
        scratch_shapes=[pltpu.VMEM((R, H), jnp.float32)],  # per-layer context slab
        compiler_params=pltpu.CompilerParams(
            dimension_semantics=("parallel",)),
    )(emb, mask,
      params["emb_ln_g"], params["emb_ln_b"],
      w_qkv, params["b_qkv"], w_o, params["b_o"],
      params["ln1_g"], params["ln1_b"],
      w1, params["b1"], w2, params["b2"],
      params["ln2_g"], params["ln2_b"],
      pooler_w, params["pooler_b"],
      fc_w, fc_b)

    return logits.reshape(B_pad, C_pad)[:B, :C]


# ------------------------------ main ------------------------------

if __name__ == "__main__":
    B, S = 2, 8
    key = jax.random.PRNGKey(0)
    k_params, k_ids, k_types = jax.random.split(key, 3)

    params = init_params(k_params, CFG)

    input_ids = jax.random.randint(k_ids, (B, S), 0, CFG["vocab_size"], dtype=jnp.int32)
    token_type_ids = jax.random.randint(k_types, (B, S), 0, CFG["type_vocab_size"],
                                        dtype=jnp.int32)
    # mask out the last two positions of the second sequence to exercise masking
    attention_mask = jnp.ones((B, S), jnp.int32).at[1, -2:].set(0)

    fwd = jax.jit(bert_classifier_forward)
    logits = fwd(params, input_ids, attention_mask, token_type_ids)
    jax.block_until_ready(logits)

    assert logits.shape == (B, CFG["num_classes"]) and logits.dtype == jnp.float32
    assert bool(jnp.all(jnp.isfinite(logits)))
    print("KERNEL_OK")
</pallas_src>

<mosaic_0001>
module attributes {stable_mosaic.version = 11 : i64} {
  func.func @_bert_fused_kernel(%arg0: i32, %arg1: memref<16x32xf32, #tpu.memory_space<vmem>>, %arg2: memref<1x1x16xf32, #tpu.memory_space<vmem>>, %arg3: memref<1x32xf32, #tpu.memory_space<vmem>>, %arg4: memref<1x32xf32, #tpu.memory_space<vmem>>, %arg5: memref<2x32x96xbf16, #tpu.memory_space<vmem>>, %arg6: memref<2x1x96xf32, #tpu.memory_space<vmem>>, %arg7: memref<2x32x32xbf16, #tpu.memory_space<vmem>>, %arg8: memref<2x1x32xf32, #tpu.memory_space<vmem>>, %arg9: memref<2x1x32xf32, #tpu.memory_space<vmem>>, %arg10: memref<2x1x32xf32, #tpu.memory_space<vmem>>, %arg11: memref<2x32x64xbf16, #tpu.memory_space<vmem>>, %arg12: memref<2x1x64xf32, #tpu.memory_space<vmem>>, %arg13: memref<2x64x32xbf16, #tpu.memory_space<vmem>>, %arg14: memref<2x1x32xf32, #tpu.memory_space<vmem>>, %arg15: memref<2x1x32xf32, #tpu.memory_space<vmem>>, %arg16: memref<2x1x32xf32, #tpu.memory_space<vmem>>, %arg17: memref<32x32xbf16, #tpu.memory_space<vmem>>, %arg18: memref<1x32xf32, #tpu.memory_space<vmem>>, %arg19: memref<32x128xbf16, #tpu.memory_space<vmem>>, %arg20: memref<1x128xf32, #tpu.memory_space<vmem>>, %arg21: memref<1x2x128xf32, #tpu.memory_space<vmem>>, %arg22: memref<16x32xf32, #tpu.memory_space<vmem>>) attributes {dimension_semantics = [#tpu.dimension_semantics<parallel>], iteration_bounds = array<i64: 1>, scalar_prefetch = 0 : i64, scratch_operands = 1 : i64, tpu.core_type = #tpu.core_type<tc>, window_params = [{transform_indices = @transform_0, window_bounds = array<i64: 16, 32>}, {transform_indices = @transform_1, window_bounds = array<i64: 1, 1, 16>}, {pipeline_mode = #tpu.pipeline_mode<synchronous>, transform_indices = @transform_2, window_bounds = array<i64: 1, 32>}, {pipeline_mode = #tpu.pipeline_mode<synchronous>, transform_indices = @transform_3, window_bounds = array<i64: 1, 32>}, {pipeline_mode = #tpu.pipeline_mode<synchronous>, transform_indices = @transform_4, window_bounds = array<i64: 2, 32, 96>}, {pipeline_mode = #tpu.pipeline_mode<synchronous>, transform_indices = @transform_5, window_bounds = array<i64: 2, 1, 96>}, {pipeline_mode = #tpu.pipeline_mode<synchronous>, transform_indices = @transform_6, window_bounds = array<i64: 2, 32, 32>}, {pipeline_mode = #tpu.pipeline_mode<synchronous>, transform_indices = @transform_7, window_bounds = array<i64: 2, 1, 32>}, {pipeline_mode = #tpu.pipeline_mode<synchronous>, transform_indices = @transform_8, window_bounds = array<i64: 2, 1, 32>}, {pipeline_mode = #tpu.pipeline_mode<synchronous>, transform_indices = @transform_9, window_bounds = array<i64: 2, 1, 32>}, {pipeline_mode = #tpu.pipeline_mode<synchronous>, transform_indices = @transform_10, window_bounds = array<i64: 2, 32, 64>}, {pipeline_mode = #tpu.pipeline_mode<synchronous>, transform_indices = @transform_11, window_bounds = array<i64: 2, 1, 64>}, {pipeline_mode = #tpu.pipeline_mode<synchronous>, transform_indices = @transform_12, window_bounds = array<i64: 2, 64, 32>}, {pipeline_mode = #tpu.pipeline_mode<synchronous>, transform_indices = @transform_13, window_bounds = array<i64: 2, 1, 32>}, {pipeline_mode = #tpu.pipeline_mode<synchronous>, transform_indices = @transform_14, window_bounds = array<i64: 2, 1, 32>}, {pipeline_mode = #tpu.pipeline_mode<synchronous>, transform_indices = @transform_15, window_bounds = array<i64: 2, 1, 32>}, {pipeline_mode = #tpu.pipeline_mode<synchronous>, transform_indices = @transform_16, window_bounds = array<i64: 32, 32>}, {pipeline_mode = #tpu.pipeline_mode<synchronous>, transform_indices = @transform_17, window_bounds = array<i64: 1, 32>}, {pipeline_mode = #tpu.pipeline_mode<synchronous>, transform_indices = @transform_18, window_bounds = array<i64: 32, 128>}, {pipeline_mode = #tpu.pipeline_mode<synchronous>, transform_indices = @transform_19, window_bounds = array<i64: 1, 128>}, {transform_indices = @transform_20, window_bounds = array<i64: 1, 2, 128>}]} {
    %c0 = arith.constant 0 : index
    %c0_0 = arith.constant 0 : index
    %0 = vector.load %arg1[%c0, %c0_0] : memref<16x32xf32, #tpu.memory_space<vmem>>, vector<16x32xf32>
    %c0_1 = arith.constant 0 : index
    %c0_2 = arith.constant 0 : index
    %1 = vector.load %arg3[%c0_1, %c0_2] : memref<1x32xf32, #tpu.memory_space<vmem>>, vector<1x32xf32>
    %c0_3 = arith.constant 0 : index
    %c0_4 = arith.constant 0 : index
    %2 = vector.load %arg4[%c0_3, %c0_4] : memref<1x32xf32, #tpu.memory_space<vmem>>, vector<1x32xf32>
    %cst = arith.constant dense<0.000000e+00> : vector<16xf32>
    %3 = vector.multi_reduction <add>, %0, %cst [1] : vector<16x32xf32> to vector<16xf32>
    %4 = vector.shape_cast %3 : vector<16xf32> to vector<16x1xf32>
    %cst_5 = arith.constant 3.200000e+01 : f32
    %5 = vector.broadcast %cst_5 : f32 to vector<16x1xf32>
    %6 = arith.divf %4, %5 : vector<16x1xf32>
    %7 = vector.broadcast %6 : vector<16x1xf32> to vector<16x32xf32>
    %8 = arith.subf %0, %7 : vector<16x32xf32>
    %9 = arith.mulf %8, %8 : vector<16x32xf32>
    %cst_6 = arith.constant dense<0.000000e+00> : vector<16xf32>
    %10 = vector.multi_reduction <add>, %9, %cst_6 [1] : vector<16x32xf32> to vector<16xf32>
    %11 = vector.shape_cast %10 : vector<16xf32> to vector<16x1xf32>
    %cst_7 = arith.constant 3.200000e+01 : f32
    %12 = vector.broadcast %cst_7 : f32 to vector<16x1xf32>
    %13 = arith.divf %11, %12 : vector<16x1xf32>
    %cst_8 = arith.constant 9.99999996E-13 : f32
    %14 = vector.broadcast %cst_8 : f32 to vector<16x1xf32>
    %15 = arith.addf %13, %14 : vector<16x1xf32>
    %16 = math.rsqrt %15 : vector<16x1xf32>
    %17 = vector.broadcast %16 : vector<16x1xf32> to vector<16x32xf32>
    %18 = arith.mulf %8, %17 : vector<16x32xf32>
    %19 = vector.broadcast %1 : vector<1x32xf32> to vector<16x32xf32>
    %20 = arith.mulf %18, %19 : vector<16x32xf32>
    %21 = vector.broadcast %2 : vector<1x32xf32> to vector<16x32xf32>
    %22 = arith.addf %20, %21 : vector<16x32xf32>
    %23 = tpu.iota {dimensions = array<i32: 0>} : vector<16x16xi32>
    %24 = tpu.iota {dimensions = array<i32: 1>} : vector<16x16xi32>
    %false = arith.constant false
    %25 = vector.broadcast %false : i1 to vector<16x16xi1>
    %c0_i32 = arith.constant 0 : i32
    %26 = vector.broadcast %c0_i32 : i32 to vector<16x16xi32>
    %27 = arith.cmpi sge, %23, %26 : vector<16x16xi32>
    %c8_i32 = arith.constant 8 : i32
    %28 = vector.broadcast %c8_i32 : i32 to vector<16x16xi32>
    %29 = arith.cmpi slt, %23, %28 : vector<16x16xi32>
    %30 = arith.andi %27, %29 : vector<16x16xi1>
    %c0_i32_9 = arith.constant 0 : i32
    %31 = vector.broadcast %c0_i32_9 : i32 to vector<16x16xi32>
    %32 = arith.cmpi sge, %24, %31 : vector<16x16xi32>
    %33 = arith.andi %30, %32 : vector<16x16xi1>
    %c8_i32_10 = arith.constant 8 : i32
    %34 = vector.broadcast %c8_i32_10 : i32 to vector<16x16xi32>
    %35 = arith.cmpi slt, %24, %34 : vector<16x16xi32>
    %36 = arith.andi %33, %35 : vector<16x16xi1>
    %37 = arith.ori %25, %36 : vector<16x16xi1>
    %c8_i32_11 = arith.constant 8 : i32
    %38 = vector.broadcast %c8_i32_11 : i32 to vector<16x16xi32>
    %39 = arith.cmpi sge, %23, %38 : vector<16x16xi32>
    %c16_i32 = arith.constant 16 : i32
    %40 = vector.broadcast %c16_i32 : i32 to vector<16x16xi32>
    %41 = arith.cmpi slt, %23, %40 : vector<16x16xi32>
    %42 = arith.andi %39, %41 : vector<16x16xi1>
    %c8_i32_12 = arith.constant 8 : i32
    %43 = vector.broadcast %c8_i32_12 : i32 to vector<16x16xi32>
    %44 = arith.cmpi sge, %24, %43 : vector<16x16xi32>
    %45 = arith.andi %42, %44 : vector<16x16xi1>
    %c16_i32_13 = arith.constant 16 : i32
    %46 = vector.broadcast %c16_i32_13 : i32 to vector<16x16xi32>
    %47 = arith.cmpi slt, %24, %46 : vector<16x16xi32>
    %48 = arith.andi %45, %47 : vector<16x16xi1>
    %49 = arith.ori %37, %48 : vector<16x16xi1>
    %c0_14 = arith.constant 0 : index
    %c0_15 = arith.constant 0 : index
    %c0_16 = arith.constant 0 : index
    %50 = vector.load %arg2[%c0_14, %c0_15, %c0_16] : memref<1x1x16xf32, #tpu.memory_space<vmem>>, vector<1x1x16xf32>
    %51 = vector.shape_cast %50 : vector<1x1x16xf32> to vector<1x16xf32>
    %cst_17 = arith.constant 0.000000e+00 : f32
    %52 = vector.broadcast %cst_17 : f32 to vector<1x16xf32>
    %53 = arith.cmpf ogt, %51, %52 : vector<1x16xf32>
    %54 = vector.broadcast %53 : vector<1x16xi1> to vector<16x16xi1>
    %55 = arith.andi %49, %54 : vector<16x16xi1>
    %cst_18 = arith.constant 0.000000e+00 : f32
    %cst_19 = arith.constant -1.000000e+09 : f32
    %56 = vector.broadcast %cst_18 : f32 to vector<16x16xf32>
    %57 = vector.broadcast %cst_19 : f32 to vector<16x16xf32>
    %58 = arith.select %55, %56, %57 : vector<16x16xi1>, vector<16x16xf32>
    %c0_i32_20 = arith.constant 0 : i32
    %59 = arith.index_cast %c0_i32_20 : i32 to index
    %c0_21 = arith.constant 0 : index
    %c0_22 = arith.constant 0 : index
    %60 = vector.load %arg5[%59, %c0_21, %c0_22] : memref<2x32x96xbf16, #tpu.memory_space<vmem>>, vector<1x32x96xbf16>
    %61 = vector.shape_cast %60 : vector<1x32x96xbf16> to vector<32x96xbf16>
    %62 = arith.truncf %22 : vector<16x32xf32> to vector<16x32xbf16>
    %cst_23 = arith.constant dense<0.000000e+00> : vector<16x96xf32>
    %63 = tpu.matmul %62, %61, %cst_23 {dimension_numbers = #tpu.dot_dimension_numbers<[1], [0], [0], [1], [0, 0, 1, 1], [], []>} : vector<16x32xbf16>, vector<32x96xbf16>, vector<16x96xf32> -> vector<16x96xf32>
    %64 = arith.index_cast %c0_i32_20 : i32 to index
    %c0_24 = arith.constant 0 : index
    %c0_25 = arith.constant 0 : index
    %65 = vector.load %arg6[%64, %c0_24, %c0_25] : memref<2x1x96xf32, #tpu.memory_space<vmem>>, vector<1x1x96xf32>
    %66 = vector.shape_cast %65 : vector<1x1x96xf32> to vector<1x96xf32>
    %67 = vector.broadcast %66 : vector<1x96xf32> to vector<16x96xf32>
    %68 = arith.addf %63, %67 : vector<16x96xf32>
    %69 = vector.extract_strided_slice %68 {offsets = [0, 0], sizes = [16, 32], strides = [1, 1]} : vector<16x96xf32> to vector<16x32xf32>
    %70 = arith.truncf %69 : vector<16x32xf32> to vector<16x32xbf16>
    %71 = vector.extract_strided_slice %68 {offsets = [0, 32], sizes = [16, 32], strides = [1, 1]} : vector<16x96xf32> to vector<16x32xf32>
    %72 = tpu.transpose %71, [1, 0] : vector<16x32xf32> -> vector<32x16xf32>
    %73 = arith.truncf %72 : vector<32x16xf32> to vector<32x16xbf16>
    %74 = vector.extract_strided_slice %68 {offsets = [0, 64], sizes = [16, 32], strides = [1, 1]} : vector<16x96xf32> to vector<16x32xf32>
    %75 = arith.truncf %74 : vector<16x32xf32> to vector<16x32xbf16>
    %76 = vector.extract_strided_slice %70 {offsets = [0, 0], sizes = [16, 8], strides = [1, 1]} : vector<16x32xbf16> to vector<16x8xbf16>
    %77 = vector.extract_strided_slice %73 {offsets = [0, 0], sizes = [8, 16], strides = [1, 1]} : vector<32x16xbf16> to vector<8x16xbf16>
    %cst_26 = arith.constant dense<0.000000e+00> : vector<16x16xf32>
    %78 = tpu.matmul %76, %77, %cst_26 {dimension_numbers = #tpu.dot_dimension_numbers<[1], [0], [0], [1], [0, 0, 1, 1], [], []>} : vector<16x8xbf16>, vector<8x16xbf16>, vector<16x16xf32> -> vector<16x16xf32>
    %cst_27 = arith.constant 0.353553385 : f32
    %79 = vector.broadcast %cst_27 : f32 to vector<16x16xf32>
    %80 = arith.mulf %78, %79 : vector<16x16xf32>
    %81 = arith.addf %80, %58 : vector<16x16xf32>
    %cst_28 = arith.constant dense<0xFF800000> : vector<16xf32>
    %82 = vector.multi_reduction <maximumf>, %81, %cst_28 [1] : vector<16x16xf32> to vector<16xf32>
    %83 = vector.shape_cast %82 : vector<16xf32> to vector<16x1xf32>
    %84 = vector.broadcast %83 : vector<16x1xf32> to vector<16x16xf32>
    %85 = arith.subf %81, %84 : vector<16x16xf32>
    %86 = math.exp %85 : vector<16x16xf32>
    %cst_29 = arith.constant dense<0.000000e+00> : vector<16xf32>
    %87 = vector.multi_reduction <add>, %86, %cst_29 [1] : vector<16x16xf32> to vector<16xf32>
    %88 = vector.shape_cast %87 : vector<16xf32> to vector<16x1xf32>
    %89 = tpu.reciprocal %88 {approx = true} : vector<16x1xf32> -> vector<16x1xf32>
    %90 = vector.broadcast %89 : vector<16x1xf32> to vector<16x16xf32>
    %91 = arith.mulf %86, %90 : vector<16x16xf32>
    %92 = arith.truncf %91 : vector<16x16xf32> to vector<16x16xbf16>
    %93 = vector.extract_strided_slice %75 {offsets = [0, 0], sizes = [16, 8], strides = [1, 1]} : vector<16x32xbf16> to vector<16x8xbf16>
    %cst_30 = arith.constant dense<0.000000e+00> : vector<16x8xf32>
    %94 = tpu.matmul %92, %93, %cst_30 {dimension_numbers = #tpu.dot_dimension_numbers<[1], [0], [0], [1], [0, 0, 1, 1], [], []>} : vector<16x16xbf16>, vector<16x8xbf16>, vector<16x8xf32> -> vector<16x8xf32>
    %c0_31 = arith.constant 0 : index
    %c0_32 = arith.constant 0 : index
    %95 = vector.load %arg22[%c0_31, %c0_32] : memref<16x32xf32, #tpu.memory_space<vmem>>, vector<16x8xf32>
    tpu.vector_store %arg22[%c0_31, %c0_32], %94 {strides = array<i32>} : memref<16x32xf32, #tpu.memory_space<vmem>>, vector<16x8xf32>,
    %96 = vector.extract_strided_slice %70 {offsets = [0, 8], sizes = [16, 8], strides = [1, 1]} : vector<16x32xbf16> to vector<16x8xbf16>
    %97 = vector.extract_strided_slice %73 {offsets = [8, 0], sizes = [8, 16], strides = [1, 1]} : vector<32x16xbf16> to vector<8x16xbf16>
    %cst_33 = arith.constant dense<0.000000e+00> : vector<16x16xf32>
    %98 = tpu.matmul %96, %97, %cst_33 {dimension_numbers = #tpu.dot_dimension_numbers<[1], [0], [0], [1], [0, 0, 1, 1], [], []>} : vector<16x8xbf16>, vector<8x16xbf16>, vector<16x16xf32> -> vector<16x16xf32>
    %cst_34 = arith.constant 0.353553385 : f32
    %99 = vector.broadcast %cst_34 : f32 to vector<16x16xf32>
    %100 = arith.mulf %98, %99 : vector<16x16xf32>
    %101 = arith.addf %100, %58 : vector<16x16xf32>
    %cst_35 = arith.constant dense<0xFF800000> : vector<16xf32>
    %102 = vector.multi_reduction <maximumf>, %101, %cst_35 [1] : vector<16x16xf32> to vector<16xf32>
    %103 = vector.shape_cast %102 : vector<16xf32> to vector<16x1xf32>
    %104 = vector.broadcast %103 : vector<16x1xf32> to vector<16x16xf32>
    %105 = arith.subf %101, %104 : vector<16x16xf32>
    %106 = math.exp %105 : vector<16x16xf32>
    %cst_36 = arith.constant dense<0.000000e+00> : vector<16xf32>
    %107 = vector.multi_reduction <add>, %106, %cst_36 [1] : vector<16x16xf32> to vector<16xf32>
    %108 = vector.shape_cast %107 : vector<16xf32> to vector<16x1xf32>
    %109 = tpu.reciprocal %108 {approx = true} : vector<16x1xf32> -> vector<16x1xf32>
    %110 = vector.broadcast %109 : vector<16x1xf32> to vector<16x16xf32>
    %111 = arith.mulf %106, %110 : vector<16x16xf32>
    %112 = arith.truncf %111 : vector<16x16xf32> to vector<16x16xbf16>
    %113 = vector.extract_strided_slice %75 {offsets = [0, 8], sizes = [16, 8], strides = [1, 1]} : vector<16x32xbf16> to vector<16x8xbf16>
    %cst_37 = arith.constant dense<0.000000e+00> : vector<16x8xf32>
    %114 = tpu.matmul %112, %113, %cst_37 {dimension_numbers = #tpu.dot_dimension_numbers<[1], [0], [0], [1], [0, 0, 1, 1], [], []>} : vector<16x16xbf16>, vector<16x8xbf16>, vector<16x8xf32> -> vector<16x8xf32>
    %c0_38 = arith.constant 0 : index
    %c8 = arith.constant 8 : index
    %115 = vector.load %arg22[%c0_38, %c8] : memref<16x32xf32, #tpu.memory_space<vmem>>, vector<16x8xf32>
    tpu.vector_store %arg22[%c0_38, %c8], %114 {strides = array<i32>} : memref<16x32xf32, #tpu.memory_space<vmem>>, vector<16x8xf32>,
    %116 = vector.extract_strided_slice %70 {offsets = [0, 16], sizes = [16, 8], strides = [1, 1]} : vector<16x32xbf16> to vector<16x8xbf16>
    %117 = vector.extract_strided_slice %73 {offsets = [16, 0], sizes = [8, 16], strides = [1, 1]} : vector<32x16xbf16> to vector<8x16xbf16>
    %cst_39 = arith.constant dense<0.000000e+00> : vector<16x16xf32>
    %118 = tpu.matmul %116, %117, %cst_39 {dimension_numbers = #tpu.dot_dimension_numbers<[1], [0], [0], [1], [0, 0, 1, 1], [], []>} : vector<16x8xbf16>, vector<8x16xbf16>, vector<16x16xf32> -> vector<16x16xf32>
    %cst_40 = arith.constant 0.353553385 : f32
    %119 = vector.broadcast %cst_40 : f32 to vector<16x16xf32>
    %120 = arith.mulf %118, %119 : vector<16x16xf32>
    %121 = arith.addf %120, %58 : vector<16x16xf32>
    %cst_41 = arith.constant dense<0xFF800000> : vector<16xf32>
    %122 = vector.multi_reduction <maximumf>, %121, %cst_41 [1] : vector<16x16xf32> to vector<16xf32>
    %123 = vector.shape_cast %122 : vector<16xf32> to vector<16x1xf32>
    %124 = vector.broadcast %123 : vector<16x1xf32> to vector<16x16xf32>
    %125 = arith.subf %121, %124 : vector<16x16xf32>
    %126 = math.exp %125 : vector<16x16xf32>
    %cst_42 = arith.constant dense<0.000000e+00> : vector<16xf32>
    %127 = vector.multi_reduction <add>, %126, %cst_42 [1] : vector<16x16xf32> to vector<16xf32>
    %128 = vector.shape_cast %127 : vector<16xf32> to vector<16x1xf32>
    %129 = tpu.reciprocal %128 {approx = true} : vector<16x1xf32> -> vector<16x1xf32>
    %130 = vector.broadcast %129 : vector<16x1xf32> to vector<16x16xf32>
    %131 = arith.mulf %126, %130 : vector<16x16xf32>
    %132 = arith.truncf %131 : vector<16x16xf32> to vector<16x16xbf16>
    %133 = vector.extract_strided_slice %75 {offsets = [0, 16], sizes = [16, 8], strides = [1, 1]} : vector<16x32xbf16> to vector<16x8xbf16>
    %cst_43 = arith.constant dense<0.000000e+00> : vector<16x8xf32>
    %134 = tpu.matmul %132, %133, %cst_43 {dimension_numbers = #tpu.dot_dimension_numbers<[1], [0], [0], [1], [0, 0, 1, 1], [], []>} : vector<16x16xbf16>, vector<16x8xbf16>, vector<16x8xf32> -> vector<16x8xf32>
    %c0_44 = arith.constant 0 : index
    %c16 = arith.constant 16 : index
    %135 = vector.load %arg22[%c0_44, %c16] : memref<16x32xf32, #tpu.memory_space<vmem>>, vector<16x8xf32>
    tpu.vector_store %arg22[%c0_44, %c16], %134 {strides = array<i32>} : memref<16x32xf32, #tpu.memory_space<vmem>>, vector<16x8xf32>,
    %136 = vector.extract_strided_slice %70 {offsets = [0, 24], sizes = [16, 8], strides = [1, 1]} : vector<16x32xbf16> to vector<16x8xbf16>
    %137 = vector.extract_strided_slice %73 {offsets = [24, 0], sizes = [8, 16], strides = [1, 1]} : vector<32x16xbf16> to vector<8x16xbf16>
    %cst_45 = arith.constant dense<0.000000e+00> : vector<16x16xf32>
    %138 = tpu.matmul %136, %137, %cst_45 {dimension_numbers = #tpu.dot_dimension_numbers<[1], [0], [0], [1], [0, 0, 1, 1], [], []>} : vector<16x8xbf16>, vector<8x16xbf16>, vector<16x16xf32> -> vector<16x16xf32>
    %cst_46 = arith.constant 0.353553385 : f32
    %139 = vector.broadcast %cst_46 : f32 to vector<16x16xf32>
    %140 = arith.mulf %138, %139 : vector<16x16xf32>
    %141 = arith.addf %140, %58 : vector<16x16xf32>
    %cst_47 = arith.constant dense<0xFF800000> : vector<16xf32>
    %142 = vector.multi_reduction <maximumf>, %141, %cst_47 [1] : vector<16x16xf32> to vector<16xf32>
    %143 = vector.shape_cast %142 : vector<16xf32> to vector<16x1xf32>
    %144 = vector.broadcast %143 : vector<16x1xf32> to vector<16x16xf32>
    %145 = arith.subf %141, %144 : vector<16x16xf32>
    %146 = math.exp %145 : vector<16x16xf32>
    %cst_48 = arith.constant dense<0.000000e+00> : vector<16xf32>
    %147 = vector.multi_reduction <add>, %146, %cst_48 [1] : vector<16x16xf32> to vector<16xf32>
    %148 = vector.shape_cast %147 : vector<16xf32> to vector<16x1xf32>
    %149 = tpu.reciprocal %148 {approx = true} : vector<16x1xf32> -> vector<16x1xf32>
    %150 = vector.broadcast %149 : vector<16x1xf32> to vector<16x16xf32>
    %151 = arith.mulf %146, %150 : vector<16x16xf32>
    %152 = arith.truncf %151 : vector<16x16xf32> to vector<16x16xbf16>
    %153 = vector.extract_strided_slice %75 {offsets = [0, 24], sizes = [16, 8], strides = [1, 1]} : vector<16x32xbf16> to vector<16x8xbf16>
    %cst_49 = arith.constant dense<0.000000e+00> : vector<16x8xf32>
    %154 = tpu.matmul %152, %153, %cst_49 {dimension_numbers = #tpu.dot_dimension_numbers<[1], [0], [0], [1], [0, 0, 1, 1], [], []>} : vector<16x16xbf16>, vector<16x8xbf16>, vector<16x8xf32> -> vector<16x8xf32>
    %c0_50 = arith.constant 0 : index
    %c24 = arith.constant 24 : index
    %155 = vector.load %arg22[%c0_50, %c24] : memref<16x32xf32, #tpu.memory_space<vmem>>, vector<16x8xf32>
    tpu.vector_store %arg22[%c0_50, %c24], %154 {strides = array<i32>} : memref<16x32xf32, #tpu.memory_space<vmem>>, vector<16x8xf32>,
    %c0_51 = arith.constant 0 : index
    %c0_52 = arith.constant 0 : index
    %156 = vector.load %arg22[%c0_51, %c0_52] : memref<16x32xf32, #tpu.memory_space<vmem>>, vector<16x32xf32>
    %157 = arith.index_cast %c0_i32_20 : i32 to index
    %c0_53 = arith.constant 0 : index
    %c0_54 = arith.constant 0 : index
    %158 = vector.load %arg7[%157, %c0_53, %c0_54] : memref<2x32x32xbf16, #tpu.memory_space<vmem>>, vector<1x32x32xbf16>
    %159 = vector.shape_cast %158 : vector<1x32x32xbf16> to vector<32x32xbf16>
    %160 = arith.truncf %156 : vector<16x32xf32> to vector<16x32xbf16>
    %cst_55 = arith.constant dense<0.000000e+00> : vector<16x32xf32>
    %161 = tpu.matmul %160, %159, %cst_55 {dimension_numbers = #tpu.dot_dimension_numbers<[1], [0], [0], [1], [0, 0, 1, 1], [], []>} : vector<16x32xbf16>, vector<32x32xbf16>, vector<16x32xf32> -> vector<16x32xf32>
    %162 = arith.index_cast %c0_i32_20 : i32 to index
    %c0_56 = arith.constant 0 : index
    %c0_57 = arith.constant 0 : index
    %163 = vector.load %arg8[%162, %c0_56, %c0_57] : memref<2x1x32xf32, #tpu.memory_space<vmem>>, vector<1x1x32xf32>
    %164 = vector.shape_cast %163 : vector<1x1x32xf32> to vector<1x32xf32>
    %165 = vector.broadcast %164 : vector<1x32xf32> to vector<16x32xf32>
    %166 = arith.addf %161, %165 : vector<16x32xf32>
    %167 = arith.addf %166, %22 : vector<16x32xf32>
    %168 = arith.index_cast %c0_i32_20 : i32 to index
    %c0_58 = arith.constant 0 : index
    %c0_59 = arith.constant 0 : index
    %169 = vector.load %arg9[%168, %c0_58, %c0_59] : memref<2x1x32xf32, #tpu.memory_space<vmem>>, vector<1x1x32xf32>
    %170 = vector.shape_cast %169 : vector<1x1x32xf32> to vector<1x32xf32>
    %171 = arith.index_cast %c0_i32_20 : i32 to index
    %c0_60 = arith.constant 0 : index
    %c0_61 = arith.constant 0 : index
    %172 = vector.load %arg10[%171, %c0_60, %c0_61] : memref<2x1x32xf32, #tpu.memory_space<vmem>>, vector<1x1x32xf32>
    %173 = vector.shape_cast %172 : vector<1x1x32xf32> to vector<1x32xf32>
    %cst_62 = arith.constant dense<0.000000e+00> : vector<16xf32>
    %174 = vector.multi_reduction <add>, %167, %cst_62 [1] : vector<16x32xf32> to vector<16xf32>
    %175 = vector.shape_cast %174 : vector<16xf32> to vector<16x1xf32>
    %cst_63 = arith.constant 3.200000e+01 : f32
    %176 = vector.broadcast %cst_63 : f32 to vector<16x1xf32>
    %177 = arith.divf %175, %176 : vector<16x1xf32>
    %178 = vector.broadcast %177 : vector<16x1xf32> to vector<16x32xf32>
    %179 = arith.subf %167, %178 : vector<16x32xf32>
    %180 = arith.mulf %179, %179 : vector<16x32xf32>
    %cst_64 = arith.constant dense<0.000000e+00> : vector<16xf32>
    %181 = vector.multi_reduction <add>, %180, %cst_64 [1] : vector<16x32xf32> to vector<16xf32>
    %182 = vector.shape_cast %181 : vector<16xf32> to vector<16x1xf32>
    %cst_65 = arith.constant 3.200000e+01 : f32
    %183 = vector.broadcast %cst_65 : f32 to vector<16x1xf32>
    %184 = arith.divf %182, %183 : vector<16x1xf32>
    %cst_66 = arith.constant 9.99999996E-13 : f32
    %185 = vector.broadcast %cst_66 : f32 to vector<16x1xf32>
    %186 = arith.addf %184, %185 : vector<16x1xf32>
    %187 = math.rsqrt %186 : vector<16x1xf32>
    %188 = vector.broadcast %187 : vector<16x1xf32> to vector<16x32xf32>
    %189 = arith.mulf %179, %188 : vector<16x32xf32>
    %190 = vector.broadcast %170 : vector<1x32xf32> to vector<16x32xf32>
    %191 = arith.mulf %189, %190 : vector<16x32xf32>
    %192 = vector.broadcast %173 : vector<1x32xf32> to vector<16x32xf32>
    %193 = arith.addf %191, %192 : vector<16x32xf32>
    %194 = arith.index_cast %c0_i32_20 : i32 to index
    %c0_67 = arith.constant 0 : index
    %c0_68 = arith.constant 0 : index
    %195 = vector.load %arg11[%194, %c0_67, %c0_68] : memref<2x32x64xbf16, #tpu.memory_space<vmem>>, vector<1x32x64xbf16>
    %196 = vector.shape_cast %195 : vector<1x32x64xbf16> to vector<32x64xbf16>
    %197 = arith.truncf %193 : vector<16x32xf32> to vector<16x32xbf16>
    %cst_69 = arith.constant dense<0.000000e+00> : vector<16x64xf32>
    %198 = tpu.matmul %197, %196, %cst_69 {dimension_numbers = #tpu.dot_dimension_numbers<[1], [0], [0], [1], [0, 0, 1, 1], [], []>} : vector<16x32xbf16>, vector<32x64xbf16>, vector<16x64xf32> -> vector<16x64xf32>
    %199 = arith.index_cast %c0_i32_20 : i32 to index
    %c0_70 = arith.constant 0 : index
    %c0_71 = arith.constant 0 : index
    %200 = vector.load %arg12[%199, %c0_70, %c0_71] : memref<2x1x64xf32, #tpu.memory_space<vmem>>, vector<1x1x64xf32>
    %201 = vector.shape_cast %200 : vector<1x1x64xf32> to vector<1x64xf32>
    %202 = vector.broadcast %201 : vector<1x64xf32> to vector<16x64xf32>
    %203 = arith.addf %198, %202 : vector<16x64xf32>
    %204 = arith.mulf %203, %203 : vector<16x64xf32>
    %205 = arith.mulf %203, %204 : vector<16x64xf32>
    %cst_72 = arith.constant 4.471500e-02 : f32
    %206 = vector.broadcast %cst_72 : f32 to vector<16x64xf32>
    %207 = arith.mulf %206, %205 : vector<16x64xf32>
    %208 = arith.addf %203, %207 : vector<16x64xf32>
    %cst_73 = arith.constant 0.797884583 : f32
    %209 = vector.broadcast %cst_73 : f32 to vector<16x64xf32>
    %210 = arith.mulf %209, %208 : vector<16x64xf32>
    %211 = math.tanh %210 : vector<16x64xf32>
    %cst_74 = arith.constant 1.000000e+00 : f32
    %212 = vector.broadcast %cst_74 : f32 to vector<16x64xf32>
    %213 = arith.addf %212, %211 : vector<16x64xf32>
    %cst_75 = arith.constant 5.000000e-01 : f32
    %214 = vector.broadcast %cst_75 : f32 to vector<16x64xf32>
    %215 = arith.mulf %214, %213 : vector<16x64xf32>
    %216 = arith.mulf %203, %215 : vector<16x64xf32>
    %217 = arith.index_cast %c0_i32_20 : i32 to index
    %c0_76 = arith.constant 0 : index
    %c0_77 = arith.constant 0 : index
    %218 = vector.load %arg13[%217, %c0_76, %c0_77] : memref<2x64x32xbf16, #tpu.memory_space<vmem>>, vector<1x64x32xbf16>
    %219 = vector.shape_cast %218 : vector<1x64x32xbf16> to vector<64x32xbf16>
    %220 = arith.truncf %216 : vector<16x64xf32> to vector<16x64xbf16>
    %cst_78 = arith.constant dense<0.000000e+00> : vector<16x32xf32>
    %221 = tpu.matmul %220, %219, %cst_78 {dimension_numbers = #tpu.dot_dimension_numbers<[1], [0], [0], [1], [0, 0, 1, 1], [], []>} : vector<16x64xbf16>, vector<64x32xbf16>, vector<16x32xf32> -> vector<16x32xf32>
    %222 = arith.index_cast %c0_i32_20 : i32 to index
    %c0_79 = arith.constant 0 : index
    %c0_80 = arith.constant 0 : index
    %223 = vector.load %arg14[%222, %c0_79, %c0_80] : memref<2x1x32xf32, #tpu.memory_space<vmem>>, vector<1x1x32xf32>
    %224 = vector.shape_cast %223 : vector<1x1x32xf32> to vector<1x32xf32>
    %225 = vector.broadcast %224 : vector<1x32xf32> to vector<16x32xf32>
    %226 = arith.addf %221, %225 : vector<16x32xf32>
    %227 = arith.addf %226, %193 : vector<16x32xf32>
    %228 = arith.index_cast %c0_i32_20 : i32 to index
    %c0_81 = arith.constant 0 : index
    %c0_82 = arith.constant 0 : index
    %229 = vector.load %arg15[%228, %c0_81, %c0_82] : memref<2x1x32xf32, #tpu.memory_space<vmem>>, vector<1x1x32xf32>
    %230 = vector.shape_cast %229 : vector<1x1x32xf32> to vector<1x32xf32>
    %231 = arith.index_cast %c0_i32_20 : i32 to index
    %c0_83 = arith.constant 0 : index
    %c0_84 = arith.constant 0 : index
    %232 = vector.load %arg16[%231, %c0_83, %c0_84] : memref<2x1x32xf32, #tpu.memory_space<vmem>>, vector<1x1x32xf32>
    %233 = vector.shape_cast %232 : vector<1x1x32xf32> to vector<1x32xf32>
    %cst_85 = arith.constant dense<0.000000e+00> : vector<16xf32>
    %234 = vector.multi_reduction <add>, %227, %cst_85 [1] : vector<16x32xf32> to vector<16xf32>
    %235 = vector.shape_cast %234 : vector<16xf32> to vector<16x1xf32>
    %cst_86 = arith.constant 3.200000e+01 : f32
    %236 = vector.broadcast %cst_86 : f32 to vector<16x1xf32>
    %237 = arith.divf %235, %236 : vector<16x1xf32>
    %238 = vector.broadcast %237 : vector<16x1xf32> to vector<16x32xf32>
    %239 = arith.subf %227, %238 : vector<16x32xf32>
    %240 = arith.mulf %239, %239 : vector<16x32xf32>
    %cst_87 = arith.constant dense<0.000000e+00> : vector<16xf32>
    %241 = vector.multi_reduction <add>, %240, %cst_87 [1] : vector<16x32xf32> to vector<16xf32>
    %242 = vector.shape_cast %241 : vector<16xf32> to vector<16x1xf32>
    %cst_88 = arith.constant 3.200000e+01 : f32
    %243 = vector.broadcast %cst_88 : f32 to vector<16x1xf32>
    %244 = arith.divf %242, %243 : vector<16x1xf32>
    %cst_89 = arith.constant 9.99999996E-13 : f32
    %245 = vector.broadcast %cst_89 : f32 to vector<16x1xf32>
    %246 = arith.addf %244, %245 : vector<16x1xf32>
    %247 = math.rsqrt %246 : vector<16x1xf32>
    %248 = vector.broadcast %247 : vector<16x1xf32> to vector<16x32xf32>
    %249 = arith.mulf %239, %248 : vector<16x32xf32>
    %250 = vector.broadcast %230 : vector<1x32xf32> to vector<16x32xf32>
    %251 = arith.mulf %249, %250 : vector<16x32xf32>
    %252 = vector.broadcast %233 : vector<1x32xf32> to vector<16x32xf32>
    %253 = arith.addf %251, %252 : vector<16x32xf32>
    %c1_i32 = arith.constant 1 : i32
    %254 = arith.index_cast %c1_i32 : i32 to index
    %c0_90 = arith.constant 0 : index
    %c0_91 = arith.constant 0 : index
    %255 = vector.load %arg5[%254, %c0_90, %c0_91] : memref<2x32x96xbf16, #tpu.memory_space<vmem>>, vector<1x32x96xbf16>
    %256 = vector.shape_cast %255 : vector<1x32x96xbf16> to vector<32x96xbf16>
    %257 = arith.truncf %253 : vector<16x32xf32> to vector<16x32xbf16>
    %cst_92 = arith.constant dense<0.000000e+00> : vector<16x96xf32>
    %258 = tpu.matmul %257, %256, %cst_92 {dimension_numbers = #tpu.dot_dimension_numbers<[1], [0], [0], [1], [0, 0, 1, 1], [], []>} : vector<16x32xbf16>, vector<32x96xbf16>, vector<16x96xf32> -> vector<16x96xf32>
    %259 = arith.index_cast %c1_i32 : i32 to index
    %c0_93 = arith.constant 0 : index
    %c0_94 = arith.constant 0 : index
    %260 = vector.load %arg6[%259, %c0_93, %c0_94] : memref<2x1x96xf32, #tpu.memory_space<vmem>>, vector<1x1x96xf32>
    %261 = vector.shape_cast %260 : vector<1x1x96xf32> to vector<1x96xf32>
    %262 = vector.broadcast %261 : vector<1x96xf32> to vector<16x96xf32>
    %263 = arith.addf %258, %262 : vector<16x96xf32>
    %264 = vector.extract_strided_slice %263 {offsets = [0, 0], sizes = [16, 32], strides = [1, 1]} : vector<16x96xf32> to vector<16x32xf32>
    %265 = arith.truncf %264 : vector<16x32xf32> to vector<16x32xbf16>
    %266 = vector.extract_strided_slice %263 {offsets = [0, 32], sizes = [16, 32], strides = [1, 1]} : vector<16x96xf32> to vector<16x32xf32>
    %267 = tpu.transpose %266, [1, 0] : vector<16x32xf32> -> vector<32x16xf32>
    %268 = arith.truncf %267 : vector<32x16xf32> to vector<32x16xbf16>
    %269 = vector.extract_strided_slice %263 {offsets = [0, 64], sizes = [16, 32], strides = [1, 1]} : vector<16x96xf32> to vector<16x32xf32>
    %270 = arith.truncf %269 : vector<16x32xf32> to vector<16x32xbf16>
    %271 = vector.extract_strided_slice %265 {offsets = [0, 0], sizes = [16, 8], strides = [1, 1]} : vector<16x32xbf16> to vector<16x8xbf16>
    %272 = vector.extract_strided_slice %268 {offsets = [0, 0], sizes = [8, 16], strides = [1, 1]} : vector<32x16xbf16> to vector<8x16xbf16>
    %cst_95 = arith.constant dense<0.000000e+00> : vector<16x16xf32>
    %273 = tpu.matmul %271, %272, %cst_95 {dimension_numbers = #tpu.dot_dimension_numbers<[1], [0], [0], [1], [0, 0, 1, 1], [], []>} : vector<16x8xbf16>, vector<8x16xbf16>, vector<16x16xf32> -> vector<16x16xf32>
    %cst_96 = arith.constant 0.353553385 : f32
    %274 = vector.broadcast %cst_96 : f32 to vector<16x16xf32>
    %275 = arith.mulf %273, %274 : vector<16x16xf32>
    %276 = arith.addf %275, %58 : vector<16x16xf32>
    %cst_97 = arith.constant dense<0xFF800000> : vector<16xf32>
    %277 = vector.multi_reduction <maximumf>, %276, %cst_97 [1] : vector<16x16xf32> to vector<16xf32>
    %278 = vector.shape_cast %277 : vector<16xf32> to vector<16x1xf32>
    %279 = vector.broadcast %278 : vector<16x1xf32> to vector<16x16xf32>
    %280 = arith.subf %276, %279 : vector<16x16xf32>
    %281 = math.exp %280 : vector<16x16xf32>
    %cst_98 = arith.constant dense<0.000000e+00> : vector<16xf32>
    %282 = vector.multi_reduction <add>, %281, %cst_98 [1] : vector<16x16xf32> to vector<16xf32>
    %283 = vector.shape_cast %282 : vector<16xf32> to vector<16x1xf32>
    %284 = tpu.reciprocal %283 {approx = true} : vector<16x1xf32> -> vector<16x1xf32>
    %285 = vector.broadcast %284 : vector<16x1xf32> to vector<16x16xf32>
    %286 = arith.mulf %281, %285 : vector<16x16xf32>
    %287 = arith.truncf %286 : vector<16x16xf32> to vector<16x16xbf16>
    %288 = vector.extract_strided_slice %270 {offsets = [0, 0], sizes = [16, 8], strides = [1, 1]} : vector<16x32xbf16> to vector<16x8xbf16>
    %cst_99 = arith.constant dense<0.000000e+00> : vector<16x8xf32>
    %289 = tpu.matmul %287, %288, %cst_99 {dimension_numbers = #tpu.dot_dimension_numbers<[1], [0], [0], [1], [0, 0, 1, 1], [], []>} : vector<16x16xbf16>, vector<16x8xbf16>, vector<16x8xf32> -> vector<16x8xf32>
    %c0_100 = arith.constant 0 : index
    %c0_101 = arith.constant 0 : index
    %290 = vector.load %arg22[%c0_100, %c0_101] : memref<16x32xf32, #tpu.memory_space<vmem>>, vector<16x8xf32>
    tpu.vector_store %arg22[%c0_100, %c0_101], %289 {strides = array<i32>} : memref<16x32xf32, #tpu.memory_space<vmem>>, vector<16x8xf32>,
    %291 = vector.extract_strided_slice %265 {offsets = [0, 8], sizes = [16, 8], strides = [1, 1]} : vector<16x32xbf16> to vector<16x8xbf16>
    %292 = vector.extract_strided_slice %268 {offsets = [8, 0], sizes = [8, 16], strides = [1, 1]} : vector<32x16xbf16> to vector<8x16xbf16>
    %cst_102 = arith.constant dense<0.000000e+00> : vector<16x16xf32>
    %293 = tpu.matmul %291, %292, %cst_102 {dimension_numbers = #tpu.dot_dimension_numbers<[1], [0], [0], [1], [0, 0, 1, 1], [], []>} : vector<16x8xbf16>, vector<8x16xbf16>, vector<16x16xf32> -> vector<16x16xf32>
    %cst_103 = arith.constant 0.353553385 : f32
    %294 = vector.broadcast %cst_103 : f32 to vector<16x16xf32>
    %295 = arith.mulf %293, %294 : vector<16x16xf32>
    %296 = arith.addf %295, %58 : vector<16x16xf32>
    %cst_104 = arith.constant dense<0xFF800000> : vector<16xf32>
    %297 = vector.multi_reduction <maximumf>, %296, %cst_104 [1] : vector<16x16xf32> to vector<16xf32>
    %298 = vector.shape_cast %297 : vector<16xf32> to vector<16x1xf32>
    %299 = vector.broadcast %298 : vector<16x1xf32> to vector<16x16xf32>
    %300 = arith.subf %296, %299 : vector<16x16xf32>
    %301 = math.exp %300 : vector<16x16xf32>
    %cst_105 = arith.constant dense<0.000000e+00> : vector<16xf32>
    %302 = vector.multi_reduction <add>, %301, %cst_105 [1] : vector<16x16xf32> to vector<16xf32>
    %303 = vector.shape_cast %302 : vector<16xf32> to vector<16x1xf32>
    %304 = tpu.reciprocal %303 {approx = true} : vector<16x1xf32> -> vector<16x1xf32>
    %305 = vector.broadcast %304 : vector<16x1xf32> to vector<16x16xf32>
    %306 = arith.mulf %301, %305 : vector<16x16xf32>
    %307 = arith.truncf %306 : vector<16x16xf32> to vector<16x16xbf16>
    %308 = vector.extract_strided_slice %270 {offsets = [0, 8], sizes = [16, 8], strides = [1, 1]} : vector<16x32xbf16> to vector<16x8xbf16>
    %cst_106 = arith.constant dense<0.000000e+00> : vector<16x8xf32>
    %309 = tpu.matmul %307, %308, %cst_106 {dimension_numbers = #tpu.dot_dimension_numbers<[1], [0], [0], [1], [0, 0, 1, 1], [], []>} : vector<16x16xbf16>, vector<16x8xbf16>, vector<16x8xf32> -> vector<16x8xf32>
    %c0_107 = arith.constant 0 : index
    %c8_108 = arith.constant 8 : index
    %310 = vector.load %arg22[%c0_107, %c8_108] : memref<16x32xf32, #tpu.memory_space<vmem>>, vector<16x8xf32>
    tpu.vector_store %arg22[%c0_107, %c8_108], %309 {strides = array<i32>} : memref<16x32xf32, #tpu.memory_space<vmem>>, vector<16x8xf32>,
    %311 = vector.extract_strided_slice %265 {offsets = [0, 16], sizes = [16, 8], strides = [1, 1]} : vector<16x32xbf16> to vector<16x8xbf16>
    %312 = vector.extract_strided_slice %268 {offsets = [16, 0], sizes = [8, 16], strides = [1, 1]} : vector<32x16xbf16> to vector<8x16xbf16>
    %cst_109 = arith.constant dense<0.000000e+00> : vector<16x16xf32>
    %313 = tpu.matmul %311, %312, %cst_109 {dimension_numbers = #tpu.dot_dimension_numbers<[1], [0], [0], [1], [0, 0, 1, 1], [], []>} : vector<16x8xbf16>, vector<8x16xbf16>, vector<16x16xf32> -> vector<16x16xf32>
    %cst_110 = arith.constant 0.353553385 : f32
    %314 = vector.broadcast %cst_110 : f32 to vector<16x16xf32>
    %315 = arith.mulf %313, %314 : vector<16x16xf32>
    %316 = arith.addf %315, %58 : vector<16x16xf32>
    %cst_111 = arith.constant dense<0xFF800000> : vector<16xf32>
    %317 = vector.multi_reduction <maximumf>, %316, %cst_111 [1] : vector<16x16xf32> to vector<16xf32>
    %318 = vector.shape_cast %317 : vector<16xf32> to vector<16x1xf32>
    %319 = vector.broadcast %318 : vector<16x1xf32> to vector<16x16xf32>
    %320 = arith.subf %316, %319 : vector<16x16xf32>
    %321 = math.exp %320 : vector<16x16xf32>
    %cst_112 = arith.constant dense<0.000000e+00> : vector<16xf32>
    %322 = vector.multi_reduction <add>, %321, %cst_112 [1] : vector<16x16xf32> to vector<16xf32>
    %323 = vector.shape_cast %322 : vector<16xf32> to vector<16x1xf32>
    %324 = tpu.reciprocal %323 {approx = true} : vector<16x1xf32> -> vector<16x1xf32>
    %325 = vector.broadcast %324 : vector<16x1xf32> to vector<16x16xf32>
    %326 = arith.mulf %321, %325 : vector<16x16xf32>
    %327 = arith.truncf %326 : vector<16x16xf32> to vector<16x16xbf16>
    %328 = vector.extract_strided_slice %270 {offsets = [0, 16], sizes = [16, 8], strides = [1, 1]} : vector<16x32xbf16> to vector<16x8xbf16>
    %cst_113 = arith.constant dense<0.000000e+00> : vector<16x8xf32>
    %329 = tpu.matmul %327, %328, %cst_113 {dimension_numbers = #tpu.dot_dimension_numbers<[1], [0], [0], [1], [0, 0, 1, 1], [], []>} : vector<16x16xbf16>, vector<16x8xbf16>, vector<16x8xf32> -> vector<16x8xf32>
    %c0_114 = arith.constant 0 : index
    %c16_115 = arith.constant 16 : index
    %330 = vector.load %arg22[%c0_114, %c16_115] : memref<16x32xf32, #tpu.memory_space<vmem>>, vector<16x8xf32>
    tpu.vector_store %arg22[%c0_114, %c16_115], %329 {strides = array<i32>} : memref<16x32xf32, #tpu.memory_space<vmem>>, vector<16x8xf32>,
    %331 = vector.extract_strided_slice %265 {offsets = [0, 24], sizes = [16, 8], strides = [1, 1]} : vector<16x32xbf16> to vector<16x8xbf16>
    %332 = vector.extract_strided_slice %268 {offsets = [24, 0], sizes = [8, 16], strides = [1, 1]} : vector<32x16xbf16> to vector<8x16xbf16>
    %cst_116 = arith.constant dense<0.000000e+00> : vector<16x16xf32>
    %333 = tpu.matmul %331, %332, %cst_116 {dimension_numbers = #tpu.dot_dimension_numbers<[1], [0], [0], [1], [0, 0, 1, 1], [], []>} : vector<16x8xbf16>, vector<8x16xbf16>, vector<16x16xf32> -> vector<16x16xf32>
    %cst_117 = arith.constant 0.353553385 : f32
    %334 = vector.broadcast %cst_117 : f32 to vector<16x16xf32>
    %335 = arith.mulf %333, %334 : vector<16x16xf32>
    %336 = arith.addf %335, %58 : vector<16x16xf32>
    %cst_118 = arith.constant dense<0xFF800000> : vector<16xf32>
    %337 = vector.multi_reduction <maximumf>, %336, %cst_118 [1] : vector<16x16xf32> to vector<16xf32>
    %338 = vector.shape_cast %337 : vector<16xf32> to vector<16x1xf32>
    %339 = vector.broadcast %338 : vector<16x1xf32> to vector<16x16xf32>
    %340 = arith.subf %336, %339 : vector<16x16xf32>
    %341 = math.exp %340 : vector<16x16xf32>
    %cst_119 = arith.constant dense<0.000000e+00> : vector<16xf32>
    %342 = vector.multi_reduction <add>, %341, %cst_119 [1] : vector<16x16xf32> to vector<16xf32>
    %343 = vector.shape_cast %342 : vector<16xf32> to vector<16x1xf32>
    %344 = tpu.reciprocal %343 {approx = true} : vector<16x1xf32> -> vector<16x1xf32>
    %345 = vector.broadcast %344 : vector<16x1xf32> to vector<16x16xf32>
    %346 = arith.mulf %341, %345 : vector<16x16xf32>
    %347 = arith.truncf %346 : vector<16x16xf32> to vector<16x16xbf16>
    %348 = vector.extract_strided_slice %270 {offsets = [0, 24], sizes = [16, 8], strides = [1, 1]} : vector<16x32xbf16> to vector<16x8xbf16>
    %cst_120 = arith.constant dense<0.000000e+00> : vector<16x8xf32>
    %349 = tpu.matmul %347, %348, %cst_120 {dimension_numbers = #tpu.dot_dimension_numbers<[1], [0], [0], [1], [0, 0, 1, 1], [], []>} : vector<16x16xbf16>, vector<16x8xbf16>, vector<16x8xf32> -> vector<16x8xf32>
    %c0_121 = arith.constant 0 : index
    %c24_122 = arith.constant 24 : index
    %350 = vector.load %arg22[%c0_121, %c24_122] : memref<16x32xf32, #tpu.memory_space<vmem>>, vector<16x8xf32>
    tpu.vector_store %arg22[%c0_121, %c24_122], %349 {strides = array<i32>} : memref<16x32xf32, #tpu.memory_space<vmem>>, vector<16x8xf32>,
    %c0_123 = arith.constant 0 : index
    %c0_124 = arith.constant 0 : index
    %351 = vector.load %arg22[%c0_123, %c0_124] : memref<16x32xf32, #tpu.memory_space<vmem>>, vector<16x32xf32>
    %352 = arith.index_cast %c1_i32 : i32 to index
    %c0_125 = arith.constant 0 : index
    %c0_126 = arith.constant 0 : index
    %353 = vector.load %arg7[%352, %c0_125, %c0_126] : memref<2x32x32xbf16, #tpu.memory_space<vmem>>, vector<1x32x32xbf16>
    %354 = vector.shape_cast %353 : vector<1x32x32xbf16> to vector<32x32xbf16>
    %355 = arith.truncf %351 : vector<16x32xf32> to vector<16x32xbf16>
    %cst_127 = arith.constant dense<0.000000e+00> : vector<16x32xf32>
    %356 = tpu.matmul %355, %354, %cst_127 {dimension_numbers = #tpu.dot_dimension_numbers<[1], [0], [0], [1], [0, 0, 1, 1], [], []>} : vector<16x32xbf16>, vector<32x32xbf16>, vector<16x32xf32> -> vector<16x32xf32>
    %357 = arith.index_cast %c1_i32 : i32 to index
    %c0_128 = arith.constant 0 : index
    %c0_129 = arith.constant 0 : index
    %358 = vector.load %arg8[%357, %c0_128, %c0_129] : memref<2x1x32xf32, #tpu.memory_space<vmem>>, vector<1x1x32xf32>
    %359 = vector.shape_cast %358 : vector<1x1x32xf32> to vector<1x32xf32>
    %360 = vector.broadcast %359 : vector<1x32xf32> to vector<16x32xf32>
    %361 = arith.addf %356, %360 : vector<16x32xf32>
    %362 = arith.addf %361, %253 : vector<16x32xf32>
    %363 = arith.index_cast %c1_i32 : i32 to index
    %c0_130 = arith.constant 0 : index
    %c0_131 = arith.constant 0 : index
    %364 = vector.load %arg9[%363, %c0_130, %c0_131] : memref<2x1x32xf32, #tpu.memory_space<vmem>>, vector<1x1x32xf32>
    %365 = vector.shape_cast %364 : vector<1x1x32xf32> to vector<1x32xf32>
    %366 = arith.index_cast %c1_i32 : i32 to index
    %c0_132 = arith.constant 0 : index
    %c0_133 = arith.constant 0 : index
    %367 = vector.load %arg10[%366, %c0_132, %c0_133] : memref<2x1x32xf32, #tpu.memory_space<vmem>>, vector<1x1x32xf32>
    %368 = vector.shape_cast %367 : vector<1x1x32xf32> to vector<1x32xf32>
    %cst_134 = arith.constant dense<0.000000e+00> : vector<16xf32>
    %369 = vector.multi_reduction <add>, %362, %cst_134 [1] : vector<16x32xf32> to vector<16xf32>
    %370 = vector.shape_cast %369 : vector<16xf32> to vector<16x1xf32>
    %cst_135 = arith.constant 3.200000e+01 : f32
    %371 = vector.broadcast %cst_135 : f32 to vector<16x1xf32>
    %372 = arith.divf %370, %371 : vector<16x1xf32>
    %373 = vector.broadcast %372 : vector<16x1xf32> to vector<16x32xf32>
    %374 = arith.subf %362, %373 : vector<16x32xf32>
    %375 = arith.mulf %374, %374 : vector<16x32xf32>
    %cst_136 = arith.constant dense<0.000000e+00> : vector<16xf32>
    %376 = vector.multi_reduction <add>, %375, %cst_136 [1] : vector<16x32xf32> to vector<16xf32>
    %377 = vector.shape_cast %376 : vector<16xf32> to vector<16x1xf32>
    %cst_137 = arith.constant 3.200000e+01 : f32
    %378 = vector.broadcast %cst_137 : f32 to vector<16x1xf32>
    %379 = arith.divf %377, %378 : vector<16x1xf32>
    %cst_138 = arith.constant 9.99999996E-13 : f32
    %380 = vector.broadcast %cst_138 : f32 to vector<16x1xf32>
    %381 = arith.addf %379, %380 : vector<16x1xf32>
    %382 = math.rsqrt %381 : vector<16x1xf32>
    %383 = vector.broadcast %382 : vector<16x1xf32> to vector<16x32xf32>
    %384 = arith.mulf %374, %383 : vector<16x32xf32>
    %385 = vector.broadcast %365 : vector<1x32xf32> to vector<16x32xf32>
    %386 = arith.mulf %384, %385 : vector<16x32xf32>
    %387 = vector.broadcast %368 : vector<1x32xf32> to vector<16x32xf32>
    %388 = arith.addf %386, %387 : vector<16x32xf32>
    %389 = arith.index_cast %c1_i32 : i32 to index
    %c0_139 = arith.constant 0 : index
    %c0_140 = arith.constant 0 : index
    %390 = vector.load %arg11[%389, %c0_139, %c0_140] : memref<2x32x64xbf16, #tpu.memory_space<vmem>>, vector<1x32x64xbf16>
    %391 = vector.shape_cast %390 : vector<1x32x64xbf16> to vector<32x64xbf16>
    %392 = arith.truncf %388 : vector<16x32xf32> to vector<16x32xbf16>
    %cst_141 = arith.constant dense<0.000000e+00> : vector<16x64xf32>
    %393 = tpu.matmul %392, %391, %cst_141 {dimension_numbers = #tpu.dot_dimension_numbers<[1], [0], [0], [1], [0, 0, 1, 1], [], []>} : vector<16x32xbf16>, vector<32x64xbf16>, vector<16x64xf32> -> vector<16x64xf32>
    %394 = arith.index_cast %c1_i32 : i32 to index
    %c0_142 = arith.constant 0 : index
    %c0_143 = arith.constant 0 : index
    %395 = vector.load %arg12[%394, %c0_142, %c0_143] : memref<2x1x64xf32, #tpu.memory_space<vmem>>, vector<1x1x64xf32>
    %396 = vector.shape_cast %395 : vector<1x1x64xf32> to vector<1x64xf32>
    %397 = vector.broadcast %396 : vector<1x64xf32> to vector<16x64xf32>
    %398 = arith.addf %393, %397 : vector<16x64xf32>
    %399 = arith.mulf %398, %398 : vector<16x64xf32>
    %400 = arith.mulf %398, %399 : vector<16x64xf32>
    %cst_144 = arith.constant 4.471500e-02 : f32
    %401 = vector.broadcast %cst_144 : f32 to vector<16x64xf32>
    %402 = arith.mulf %401, %400 : vector<16x64xf32>
    %403 = arith.addf %398, %402 : vector<16x64xf32>
    %cst_145 = arith.constant 0.797884583 : f32
    %404 = vector.broadcast %cst_145 : f32 to vector<16x64xf32>
    %405 = arith.mulf %404, %403 : vector<16x64xf32>
    %406 = math.tanh %405 : vector<16x64xf32>
    %cst_146 = arith.constant 1.000000e+00 : f32
    %407 = vector.broadcast %cst_146 : f32 to vector<16x64xf32>
    %408 = arith.addf %407, %406 : vector<16x64xf32>
    %cst_147 = arith.constant 5.000000e-01 : f32
    %409 = vector.broadcast %cst_147 : f32 to vector<16x64xf32>
    %410 = arith.mulf %409, %408 : vector<16x64xf32>
    %411 = arith.mulf %398, %410 : vector<16x64xf32>
    %412 = arith.index_cast %c1_i32 : i32 to index
    %c0_148 = arith.constant 0 : index
    %c0_149 = arith.constant 0 : index
    %413 = vector.load %arg13[%412, %c0_148, %c0_149] : memref<2x64x32xbf16, #tpu.memory_space<vmem>>, vector<1x64x32xbf16>
    %414 = vector.shape_cast %413 : vector<1x64x32xbf16> to vector<64x32xbf16>
    %415 = arith.truncf %411 : vector<16x64xf32> to vector<16x64xbf16>
    %cst_150 = arith.constant dense<0.000000e+00> : vector<16x32xf32>
    %416 = tpu.matmul %415, %414, %cst_150 {dimension_numbers = #tpu.dot_dimension_numbers<[1], [0], [0], [1], [0, 0, 1, 1], [], []>} : vector<16x64xbf16>, vector<64x32xbf16>, vector<16x32xf32> -> vector<16x32xf32>
    %417 = arith.index_cast %c1_i32 : i32 to index
    %c0_151 = arith.constant 0 : index
    %c0_152 = arith.constant 0 : index
    %418 = vector.load %arg14[%417, %c0_151, %c0_152] : memref<2x1x32xf32, #tpu.memory_space<vmem>>, vector<1x1x32xf32>
    %419 = vector.shape_cast %418 : vector<1x1x32xf32> to vector<1x32xf32>
    %420 = vector.broadcast %419 : vector<1x32xf32> to vector<16x32xf32>
    %421 = arith.addf %416, %420 : vector<16x32xf32>
    %422 = arith.addf %421, %388 : vector<16x32xf32>
    %423 = arith.index_cast %c1_i32 : i32 to index
    %c0_153 = arith.constant 0 : index
    %c0_154 = arith.constant 0 : index
    %424 = vector.load %arg15[%423, %c0_153, %c0_154] : memref<2x1x32xf32, #tpu.memory_space<vmem>>, vector<1x1x32xf32>
    %425 = vector.shape_cast %424 : vector<1x1x32xf32> to vector<1x32xf32>
    %426 = arith.index_cast %c1_i32 : i32 to index
    %c0_155 = arith.constant 0 : index
    %c0_156 = arith.constant 0 : index
    %427 = vector.load %arg16[%426, %c0_155, %c0_156] : memref<2x1x32xf32, #tpu.memory_space<vmem>>, vector<1x1x32xf32>
    %428 = vector.shape_cast %427 : vector<1x1x32xf32> to vector<1x32xf32>
    %cst_157 = arith.constant dense<0.000000e+00> : vector<16xf32>
    %429 = vector.multi_reduction <add>, %422, %cst_157 [1] : vector<16x32xf32> to vector<16xf32>
    %430 = vector.shape_cast %429 : vector<16xf32> to vector<16x1xf32>
    %cst_158 = arith.constant 3.200000e+01 : f32
    %431 = vector.broadcast %cst_158 : f32 to vector<16x1xf32>
    %432 = arith.divf %430, %431 : vector<16x1xf32>
    %433 = vector.broadcast %432 : vector<16x1xf32> to vector<16x32xf32>
    %434 = arith.subf %422, %433 : vector<16x32xf32>
    %435 = arith.mulf %434, %434 : vector<16x32xf32>
    %cst_159 = arith.constant dense<0.000000e+00> : vector<16xf32>
    %436 = vector.multi_reduction <add>, %435, %cst_159 [1] : vector<16x32xf32> to vector<16xf32>
    %437 = vector.shape_cast %436 : vector<16xf32> to vector<16x1xf32>
    %cst_160 = arith.constant 3.200000e+01 : f32
    %438 = vector.broadcast %cst_160 : f32 to vector<16x1xf32>
    %439 = arith.divf %437, %438 : vector<16x1xf32>
    %cst_161 = arith.constant 9.99999996E-13 : f32
    %440 = vector.broadcast %cst_161 : f32 to vector<16x1xf32>
    %441 = arith.addf %439, %440 : vector<16x1xf32>
    %442 = math.rsqrt %441 : vector<16x1xf32>
    %443 = vector.broadcast %442 : vector<16x1xf32> to vector<16x32xf32>
    %444 = arith.mulf %434, %443 : vector<16x32xf32>
    %445 = vector.broadcast %425 : vector<1x32xf32> to vector<16x32xf32>
    %446 = arith.mulf %444, %445 : vector<16x32xf32>
    %447 = vector.broadcast %428 : vector<1x32xf32> to vector<16x32xf32>
    %448 = arith.addf %446, %447 : vector<16x32xf32>
    %c2_i32 = arith.constant 2 : i32
    %449 = vector.extract_strided_slice %448 {offsets = [0, 0], sizes = [1, 32], strides = [1, 1]} : vector<16x32xf32> to vector<1x32xf32>
    %450 = vector.extract_strided_slice %448 {offsets = [8, 0], sizes = [1, 32], strides = [1, 1]} : vector<16x32xf32> to vector<1x32xf32>
    %451 = tpu.concatenate %449, %450 in 0 : vector<1x32xf32>, vector<1x32xf32> -> vector<2x32xf32>
    %c0_162 = arith.constant 0 : index
    %c0_163 = arith.constant 0 : index
    %452 = vector.load %arg17[%c0_162, %c0_163] : memref<32x32xbf16, #tpu.memory_space<vmem>>, vector<32x32xbf16>
    %453 = arith.truncf %451 : vector<2x32xf32> to vector<2x32xbf16>
    %cst_164 = arith.constant dense<0.000000e+00> : vector<2x32xf32>
    %454 = tpu.matmul %453, %452, %cst_164 {dimension_numbers = #tpu.dot_dimension_numbers<[1], [0], [0], [1], [0, 0, 1, 1], [], []>} : vector<2x32xbf16>, vector<32x32xbf16>, vector<2x32xf32> -> vector<2x32xf32>
    %c0_165 = arith.constant 0 : index
    %c0_166 = arith.constant 0 : index
    %455 = vector.load %arg18[%c0_165, %c0_166] : memref<1x32xf32, #tpu.memory_space<vmem>>, vector<1x32xf32>
    %456 = vector.broadcast %455 : vector<1x32xf32> to vector<2x32xf32>
    %457 = arith.addf %454, %456 : vector<2x32xf32>
    %458 = math.tanh %457 : vector<2x32xf32>
    %c0_167 = arith.constant 0 : index
    %c0_168 = arith.constant 0 : index
    %459 = vector.load %arg19[%c0_167, %c0_168] : memref<32x128xbf16, #tpu.memory_space<vmem>>, vector<32x128xbf16>
    %460 = arith.truncf %458 : vector<2x32xf32> to vector<2x32xbf16>
    %cst_169 = arith.constant dense<0.000000e+00> : vector<2x128xf32>
    %461 = tpu.matmul %460, %459, %cst_169 {dimension_numbers = #tpu.dot_dimension_numbers<[1], [0], [0], [1], [0, 0, 1, 1], [], []>} : vector<2x32xbf16>, vector<32x128xbf16>, vector<2x128xf32> -> vector<2x128xf32>
    %c0_170 = arith.constant 0 : index
    %c0_171 = arith.constant 0 : index
    %462 = vector.load %arg20[%c0_170, %c0_171] : memref<1x128xf32, #tpu.memory_space<vmem>>, vector<1x128xf32>
    %463 = vector.broadcast %462 : vector<1x128xf32> to vector<2x128xf32>
    %464 = arith.addf %461, %463 : vector<2x128xf32>
    %465 = vector.shape_cast %464 : vector<2x128xf32> to vector<1x2x128xf32>
    %c0_172 = arith.constant 0 : index
    %c0_173 = arith.constant 0 : index
    %c0_174 = arith.constant 0 : index
    %466 = vector.load %arg21[%c0_172, %c0_173, %c0_174] : memref<1x2x128xf32, #tpu.memory_space<vmem>>, vector<1x2x128xf32>
    tpu.vector_store %arg21[%c0_172, %c0_173, %c0_174], %465 {strides = array<i32>} : memref<1x2x128xf32, #tpu.memory_space<vmem>>, vector<1x2x128xf32>,
    return
  }
  func.func @transform_0(%arg0: i32) -> (i32, i32) {
    %c0_i32 = arith.constant 0 : i32
    %c0_i32_0 = arith.constant 0 : i32
    return %arg0, %c0_i32 : i32, i32
  }
  func.func @transform_1(%arg0: i32) -> (i32, i32, i32) {
    %c0_i32 = arith.constant 0 : i32
    %c0_i32_0 = arith.constant 0 : i32
    %c0_i32_1 = arith.constant 0 : i32
    return %arg0, %c0_i32, %c0_i32_0 : i32, i32, i32
  }
  func.func @transform_2(%arg0: i32) -> (i32, i32) {
    %c0_i32 = arith.constant 0 : i32
    %c0_i32_0 = arith.constant 0 : i32
    %c0_i32_1 = arith.constant 0 : i32
    return %c0_i32, %c0_i32_0 : i32, i32
  }
  func.func @transform_3(%arg0: i32) -> (i32, i32) {
    %c0_i32 = arith.constant 0 : i32
    %c0_i32_0 = arith.constant 0 : i32
    %c0_i32_1 = arith.constant 0 : i32
    return %c0_i32, %c0_i32_0 : i32, i32
  }
  func.func @transform_4(%arg0: i32) -> (i32, i32, i32) {
    %c0_i32 = arith.constant 0 : i32
    %c0_i32_0 = arith.constant 0 : i32
    %c0_i32_1 = arith.constant 0 : i32
    %c0_i32_2 = arith.constant 0 : i32
    return %c0_i32, %c0_i32_0, %c0_i32_1 : i32, i32, i32
  }
  func.func @transform_5(%arg0: i32) -> (i32, i32, i32) {
    %c0_i32 = arith.constant 0 : i32
    %c0_i32_0 = arith.constant 0 : i32
    %c0_i32_1 = arith.constant 0 : i32
    %c0_i32_2 = arith.constant 0 : i32
    return %c0_i32, %c0_i32_0, %c0_i32_1 : i32, i32, i32
  }
  func.func @transform_6(%arg0: i32) -> (i32, i32, i32) {
    %c0_i32 = arith.constant 0 : i32
    %c0_i32_0 = arith.constant 0 : i32
    %c0_i32_1 = arith.constant 0 : i32
    %c0_i32_2 = arith.constant 0 : i32
    return %c0_i32, %c0_i32_0, %c0_i32_1 : i32, i32, i32
  }
  func.func @transform_7(%arg0: i32) -> (i32, i32, i32) {
    %c0_i32 = arith.constant 0 : i32
    %c0_i32_0 = arith.constant 0 : i32
    %c0_i32_1 = arith.constant 0 : i32
    %c0_i32_2 = arith.constant 0 : i32
    return %c0_i32, %c0_i32_0, %c0_i32_1 : i32, i32, i32
  }
  func.func @transform_8(%arg0: i32) -> (i32, i32, i32) {
    %c0_i32 = arith.constant 0 : i32
    %c0_i32_0 = arith.constant 0 : i32
    %c0_i32_1 = arith.constant 0 : i32
    %c0_i32_2 = arith.constant 0 : i32
    return %c0_i32, %c0_i32_0, %c0_i32_1 : i32, i32, i32
  }
  func.func @transform_9(%arg0: i32) -> (i32, i32, i32) {
    %c0_i32 = arith.constant 0 : i32
    %c0_i32_0 = arith.constant 0 : i32
    %c0_i32_1 = arith.constant 0 : i32
    %c0_i32_2 = arith.constant 0 : i32
    return %c0_i32, %c0_i32_0, %c0_i32_1 : i32, i32, i32
  }
  func.func @transform_10(%arg0: i32) -> (i32, i32, i32) {
    %c0_i32 = arith.constant 0 : i32
    %c0_i32_0 = arith.constant 0 : i32
    %c0_i32_1 = arith.constant 0 : i32
    %c0_i32_2 = arith.constant 0 : i32
    return %c0_i32, %c0_i32_0, %c0_i32_1 : i32, i32, i32
  }
  func.func @transform_11(%arg0: i32) -> (i32, i32, i32) {
    %c0_i32 = arith.constant 0 : i32
    %c0_i32_0 = arith.constant 0 : i32
    %c0_i32_1 = arith.constant 0 : i32
    %c0_i32_2 = arith.constant 0 : i32
    return %c0_i32, %c0_i32_0, %c0_i32_1 : i32, i32, i32
  }
  func.func @transform_12(%arg0: i32) -> (i32, i32, i32) {
    %c0_i32 = arith.constant 0 : i32
    %c0_i32_0 = arith.constant 0 : i32
    %c0_i32_1 = arith.constant 0 : i32
    %c0_i32_2 = arith.constant 0 : i32
    return %c0_i32, %c0_i32_0, %c0_i32_1 : i32, i32, i32
  }
  func.func @transform_13(%arg0: i32) -> (i32, i32, i32) {
    %c0_i32 = arith.constant 0 : i32
    %c0_i32_0 = arith.constant 0 : i32
    %c0_i32_1 = arith.constant 0 : i32
    %c0_i32_2 = arith.constant 0 : i32
    return %c0_i32, %c0_i32_0, %c0_i32_1 : i32, i32, i32
  }
  func.func @transform_14(%arg0: i32) -> (i32, i32, i32) {
    %c0_i32 = arith.constant 0 : i32
    %c0_i32_0 = arith.constant 0 : i32
    %c0_i32_1 = arith.constant 0 : i32
    %c0_i32_2 = arith.constant 0 : i32
    return %c0_i32, %c0_i32_0, %c0_i32_1 : i32, i32, i32
  }
  func.func @transform_15(%arg0: i32) -> (i32, i32, i32) {
    %c0_i32 = arith.constant 0 : i32
    %c0_i32_0 = arith.constant 0 : i32
    %c0_i32_1 = arith.constant 0 : i32
    %c0_i32_2 = arith.constant 0 : i32
    return %c0_i32, %c0_i32_0, %c0_i32_1 : i32, i32, i32
  }
  func.func @transform_16(%arg0: i32) -> (i32, i32) {
    %c0_i32 = arith.constant 0 : i32
    %c0_i32_0 = arith.constant 0 : i32
    %c0_i32_1 = arith.constant 0 : i32
    return %c0_i32, %c0_i32_0 : i32, i32
  }
  func.func @transform_17(%arg0: i32) -> (i32, i32) {
    %c0_i32 = arith.constant 0 : i32
    %c0_i32_0 = arith.constant 0 : i32
    %c0_i32_1 = arith.constant 0 : i32
    return %c0_i32, %c0_i32_0 : i32, i32
  }
  func.func @transform_18(%arg0: i32) -> (i32, i32) {
    %c0_i32 = arith.constant 0 : i32
    %c0_i32_0 = arith.constant 0 : i32
    %c0_i32_1 = arith.constant 0 : i32
    return %c0_i32, %c0_i32_0 : i32, i32
  }
  func.func @transform_19(%arg0: i32) -> (i32, i32) {
    %c0_i32 = arith.constant 0 : i32
    %c0_i32_0 = arith.constant 0 : i32
    %c0_i32_1 = arith.constant 0 : i32
    return %c0_i32, %c0_i32_0 : i32, i32
  }
  func.func @transform_20(%arg0: i32) -> (i32, i32, i32) {
    %c0_i32 = arith.constant 0 : i32
    %c0_i32_0 = arith.constant 0 : i32
    %c0_i32_1 = arith.constant 0 : i32
    return %arg0, %c0_i32, %c0_i32_0 : i32, i32, i32
  }
}

</mosaic_0001>

<bundles_post_ra>
// kernel: bert_classifier_forward.1
= control target key start
LH: loop header
LB: loop body
LE: loop exit
PB: predicated region body
PF: predicated region fallthrough
CT: control target
= control target key end

     0   :  { %s3332_s0 = inlined_call_operand.vmem [shape: f32[16,32], index: 0, kind: input, shape index: {}]   ;;  %s3333_s1 = inlined_call_operand.vmem [shape: f32[1,1,16], index: 1, kind: input, shape index: {}]   ;;  %s3334_s2 = inlined_call_operand.vmem [shape: f32[1,32], index: 2, kind: input, shape index: {}]   ;;  %s3335_s3 = inlined_call_operand.vmem [shape: f32[1,32], index: 3, kind: input, shape index: {}]   ;;  %s3336_s4 = inlined_call_operand.vmem [shape: bf16[2,32,96], index: 4, kind: input, shape index: {}]   ;;  %s3337_s5 = inlined_call_operand.vmem [shape: f32[2,1,96], index: 5, kind: input, shape index: {}]   ;;  %s3338_s6 = inlined_call_operand.vmem [shape: bf16[2,32,32], index: 6, kind: input, shape index: {}]   ;;  %s3339_s7 = inlined_call_operand.vmem [shape: f32[2,1,32], index: 7, kind: input, shape index: {}]   ;;  %s3340_s8 = inlined_call_operand.vmem [shape: f32[2,1,32], index: 8, kind: input, shape index: {}]   ;;  %s3341_s9 = inlined_call_operand.vmem [shape: f32[2,1,32], index: 9, kind: input, shape index: {}]   ;;  %s3342_s10 = inlined_call_operand.vmem [shape: bf16[2,32,64], index: 10, kind: input, shape index: {}]   ;;  %s3343_s11 = inlined_call_operand.vmem [shape: f32[2,1,64], index: 11, kind: input, shape index: {}]   ;;  %s3344_s12 = inlined_call_operand.vmem [shape: bf16[2,64,32], index: 12, kind: input, shape index: {}]   ;;  %s3345_s13 = inlined_call_operand.vmem [shape: f32[2,1,32], index: 13, kind: input, shape index: {}]   ;;  %s3346_s14 = inlined_call_operand.vmem [shape: f32[2,1,32], index: 14, kind: input, shape index: {}]   ;;  %s3347_s15 = inlined_call_operand.vmem [shape: f32[2,1,32], index: 15, kind: input, shape index: {}]   ;;  %s3348_s16 = inlined_call_operand.vmem [shape: bf16[32,32], index: 16, kind: input, shape index: {}]   ;;  %s3349_s17 = inlined_call_operand.vmem [shape: f32[1,32], index: 17, kind: input, shape index: {}]   ;;  %s3350_s18 = inlined_call_operand.vmem [shape: bf16[32,128], index: 18, kind: input, shape index: {}]   ;;  %s3351_s19 = inlined_call_operand.vmem [shape: f32[1,128], index: 19, kind: input, shape index: {}]   ;;  %s3352_s20 = inlined_call_operand.hbm [shape: f32[1,2,128], index: 20, kind: output, shape index: {}]  }
   0x1   :  { %3362 = sst [smem:[#allocation6_spill]] %s3332_s0 }
   0x2   :  { %3363 = sst [smem:[#allocation7_spill]] %s3333_s1 }
   0x3   :  { %3364 = sst [smem:[#allocation8_spill]] %s3334_s2 }
   0x4   :  { %3365 = sst [smem:[#allocation9_spill]] %s3335_s3 }
   0x5   :  { %3366 = sst [smem:[#allocation10_spill]] %s3336_s4 }
   0x6   :  { %s3367_s23 = sld [smem:[#allocation6_spill]]  ;;  %vm71_vm0 = vcmask 261120  }
   0xc   :  { %v67_v0 = vld [vmem:[%s3367_s23] sm:$0xff]  ;;  %v68_v1 = vld [vmem:[%s3367_s23 + $0x8] sm:$0xff] }
   0xd   :  { %v72_v2 = vsel %vm71_vm0, %v67_v0, 0.0  ;;  %v75_v3 = vsel %vm71_vm0, %v68_v1, 0.0 }
   0xe   :  { %73 = vadd.xlane.f32.xlu0 %v72_v2 }
  0x12   :  { %76 = vadd.xlane.f32.xlu0 %v75_v3 }
  0x13   :  { %25 = vsyncpa [#allocation4], 0  ;;  %s3368_s26 = sld [smem:[#allocation10_spill]]  ;;  %v2778_v15 = vmov 0.0   ;;  %vm2779_vm1 = vmmov 0   ;;  %s3369_s30 = sld [smem:[#allocation8_spill]]  ;;  %v118_v59 = vlaneseq }
  0x14   :  { %2436 = vmatprep.subr.bf16.mxu0 %v2778_v15  ;;  %2444 = vmatprep.subr.bf16.mxu1 %v2778_v15  ;;  %s3370_s1 = sld [smem:[#allocation9_spill]]  ;;  %v2274_v34 = vld [vmem:[%s3337_s5] ss:$0 sm:$0xff]  ;;  %s2780_s24 = smov 96   ;;  %vm273_vm2 = vcmask 1043456   ;;  %vm269_vm3 = vcmask 64512  }
  0x15   :  { %2440 = vmatprep.mubr.msk.bf16.mxu0 %vm2779_vm1, %v2778_v15  ;;  %2446 = vmatprep.mubr.msk.bf16.mxu1 %vm2779_vm1, %v2778_v15  ;;  %s2781_s2 = smov 112   ;;  %s2782_s25 = smov 120   ;;  %v150_v61 = vshrl.u32 %v118_v59, 7  ;;  %v2784_v63 = vmov 0   ;;  %vm322_vm12 = vcmask 130048   ;;  %vm529_vm13 = vcmask 130112  }
  0x16   :  { %s2783_s3 = smov 104   ;;  %s3371_s4 = sld [smem:[#allocation7_spill]]  ;;  %vm663_vm14 = vcmask 195712   ;;  %vm799_vm15 = vcmask 261312  }
  0x17   :  { %v151_v62 = vsub.s32 0, %v150_v61  ;;  %s3361_s29 = smov 64   ;;  %s2788_s0 = smov 40  }
  0x18   :  { %s2789_s21 = smov 56   ;;  %s3355_s22 = smov 24  }
  0x19   :  { %v2636_v14 = vld [vmem:[%s3368_s26] sm:$0xff]   ;;  %v2637_v16 = vld [vmem:[%s3368_s26 + $0x8] sm:$0xff]  }
  0x1a   :  { %2437 = vmatpush3.bf16.msra.mxu0 %v2636_v14  ;;  %v2272_v25 = vld [vmem:[%s3369_s30] ss:$0 sm:$0xff]  ;;  %s2787_s30 = smov 48  }
  0x1b   :  { %2438 = vmatprep.subr.bf16.mxu0 %v2778_v15  ;;  %v2273_v29 = vld [vmem:[%s3370_s1] ss:$0 sm:$0xff]  ;;  %s3359_s1 = smov 8  }
  0x1c   :  { %v146_v60 = vld [vmem:[%s3371_s4] sm:$0x1]  ;;  %s3357_s4 = smov 16  }
  0x1d   :  { %vm147_vm4 = vcmp.gt.f32.partialorder %v146_v60, 0.0 }
  0x1e   :  { %2439 = vmatpush3.bf16.msra.mxu0 %v2637_v16 }
  0x1f   :  { %2456 = vmatprep.subr.bf16.mxu0 %v2778_v15 }
  0x9b   :  { %v74_v4 = vpop.xlane.xlu0 %73 }
  0x9c   :  { %v79_v5 = vmul.f32 0.03125, %v74_v4  ;;  %v2785_v4 = vmov -1e+09  }
  0x9e   :  { %v81_v6 = vsub.f32 %v67_v0, %v79_v5  ;;  %v148_v0 = vsel %vm147_vm4, 1, %v2784_v63  ;;  %vm1044_vm4 = vcmask 523264  }
  0x9f   :  { %v77_v7 = vpop.xlane.xlu0 %76  ;;  %v152_v2 = vrot.slane %v148_v0, %v151_v62 }
  0xa0   :  { %v80_v8 = vmul.f32 0.03125, %v77_v7  ;;  %v83_v9 = vmul.f32 %v81_v6, %v81_v6 }
  0xa1   :  { %vm153_vm8 = vcmp.eq.s32.totalorder %v152_v2, 1 }
  0xa2   :  { %v82_v10 = vsub.f32 %v68_v1, %v80_v8  ;;  %v85_v11 = vsel %vm71_vm0, %v83_v9, 0.0  ;;  %v119_v1 = vand.u32 127, %v118_v59 }
  0xa3   :  { %86 = vadd.xlane.f32.xlu1 %v85_v11 }
  0xa4   :  { %v84_v12 = vmul.f32 %v82_v10, %v82_v10  ;;  %vm138_vm5 = vcmp.ge.s32.totalorder %v119_v1, 8  ;;  %vm141_vm6 = vcmp.lt.s32.totalorder %v119_v1, 16  ;;  %vm129_vm7 = vcmp.lt.s32.totalorder %v119_v1, 8 }
  0xa5   :  { %vm143_vm9 = vmand %vm138_vm5, %vm141_vm6 }
  0xa6   :  { %v88_v13 = vsel %vm71_vm0, %v84_v12, 0.0  ;;  %vm154_vm10 = vmand %vm129_vm7, %vm153_vm8 }
  0xa7   :  { %89 = vadd.xlane.f32.xlu1 %v88_v13  ;;  %vm155_vm11 = vmand %vm143_vm9, %vm153_vm8  ;;  %v2975_v5 = vsel %vm154_vm10, 0.0, %v2785_v4 }
 0x130   :  { %v87_v17 = vpop.xlane.xlu1 %86 }
 0x131   :  { %v91_v18 = vmul.f32 0.03125, %v87_v17 }
 0x133   :  { %v93_v19 = vadd.f32 1e-12, %v91_v18 }
 0x134   :  { %v90_v20 = vpop.xlane.xlu1 %89 }
 0x135   :  { %2660 = vrsqrt.f32 %v93_v19  ;;  %v92_v21 = vmul.f32 0.03125, %v90_v20 }
 0x137   :  { %v94_v22 = vadd.f32 1e-12, %v92_v21 }
 0x139   :  { %2662 = vrsqrt.f32 %v94_v22 }
 0x13f   :  { %v2661_v23 = vpop.eup %2660 }
 0x140   :  { %v97_v24 = vmul.f32 %v2661_v23, %v81_v6 }
 0x142   :  { %v105_v28 = vmul.f32 %v2272_v25, %v97_v24 }
 0x143   :  { %v2663_v26 = vpop.eup %2662 }
 0x144   :  { %v98_v27 = vmul.f32 %v2663_v26, %v82_v10  ;;  %v2929_v31 = vadd.f32 %v2273_v29, %v105_v28  ;;  %v2977_v10 = vsel %vm155_vm11, 0.0, %v2785_v4 }
 0x146   :  { %v106_v30 = vmul.f32 %v2272_v25, %v98_v27 }
 0x148   :  { %v2931_v32 = vadd.f32 %v2273_v29, %v106_v30 }
 0x14a   :  { %v162_v33 = vpack.c.bf16 %v2931_v32, %v2929_v31 }
 0x14c   :  { %2441 = vmatmul.mubr.msk.bf16.vlgmr.msra.gmra.mrb[0].mxu0 %vm71_vm0, %v162_v33 }
 0x14d   :  { %2458 = vmatprep.mubr.msk.bf16.mxu0 %vm2779_vm1, %v2778_v15 }
 0x21f   :  { %v219_v35 = vpop.f32.mrb[0].mxu0 }
 0x220   :  { %v220_v36 = vadd.f32 %v2274_v34, %v219_v35  ;;  %v2442_v37 = vpop.f32.mrb[1].mxu0 }
 0x221   :  { %v222_v38 = vpop.f32.mrb[2].mxu0 }
 0x222   :  { %v223_v39 = vadd.f32 %v2274_v34, %v222_v38  ;;  %229 = vrot.lane.b32.xlu0 %v220_v36, %s2780_s24  ;;  %v2443_v40 = vpop.f32.mrb[3].mxu0 }
 0x224   :  { %v2942_v41 = vpack.c.bf16 %v223_v39, %v220_v36  ;;  %231 = vrot.lane.b32.xlu1 %v223_v39, %s2780_s24 }
 0x226   :  { %532 = vrot.lane.b32.xlu0 %v2942_v41, %s2781_s2 }
 0x228   :  { %396 = vrot.lane.b32.xlu1 %v2942_v41, %s2782_s25 }
 0x22a   :  { %666 = vrot.lane.b32.xlu0 %v2942_v41, %s2783_s3 }
 0x294   :  { %v230_v42 = vpop.permute.xlu0 %229 }
 0x295   :  { %235 = vxpose.xlu1.b32.start [1/2] (short) (narrow) %v230_v42, 32 }
 0x296   :  { %v232_v43 = vpop.permute.xlu1 %231 }
 0x298   :  { %v533_v57 = vpop.permute.xlu0 %532 }
 0x299   :  { %236 = vxpose.xlu1.b32.end [2/2] (short) (narrow) %v232_v43, 32 }
 0x29a   :  { %v397_v44 = vpop.permute.xlu1 %396 }
 0x29c   :  { %v667_v58 = vpop.permute.xlu0 %666 }
 0x315   :  { %v251_v45 = vpop.trf.xlu1 }
 0x319   :  { %v252_v46 = vpop.trf.xlu1 }
 0x31a   :  { %v267_v47 = vpack.c.bf16 %v252_v46, %v251_v45 }
 0x31c   :  { %v399_v48 = vrot.slane %v267_v47, 4  ;;  %v275_v49 = vsel %vm273_vm2, %v267_v47, 0 }
 0x31d   :  { %2445 = vmatpush3.bf16.msra.mxu1 %v275_v49  ;;  %v253_v50 = vpop.trf.xlu1 }
 0x31e   :  { %v404_v51 = vsel %vm273_vm2, %v399_v48, 0  ;;  %2450 = vmatprep.subr.bf16.mxu1 %v2778_v15 }
 0x31f   :  { %2457 = vmatpush3.bf16.msra.mxu0 %v404_v51 }
 0x320   :  { %2447 = vmatmul.mubr.msk.bf16.vlgmr.msra.gmra.mrb[0].mxu1 %vm269_vm3, %v2942_v41  ;;  %2468 = vmatprep.subr.bf16.mxu0 %v2778_v15 }
 0x321   :  { %v254_v52 = vpop.trf.xlu1  ;;  %2452 = vmatprep.mubr.msk.bf16.mxu1 %vm2779_vm1, %v2778_v15 }
 0x322   :  { %2459 = vmatmul.mubr.msk.bf16.vlgmr.msra.gmra.mrb[4].mxu0 %vm269_vm3, %v397_v44  ;;  %v268_v53 = vpack.c.bf16 %v254_v52, %v253_v50 }
 0x323   :  { %2470 = vmatprep.mubr.msk.bf16.mxu0 %vm2779_vm1, %v2778_v15 }
 0x324   :  { %v538_v54 = vsel %vm273_vm2, %v268_v53, 0  ;;  %v669_v55 = vrot.slane %v268_v53, 4 }
 0x325   :  { %2469 = vmatpush3.bf16.msra.mxu0 %v538_v54 }
 0x326   :  { %2480 = vmatprep.subr.bf16.mxu0 %v2778_v15  ;;  %v674_v56 = vsel %vm273_vm2, %v669_v55, 0 }
 0x32a   :  { %2471 = vmatmul.mubr.msk.bf16.vlgmr.msra.gmra.mrb[8].mxu0 %vm269_vm3, %v533_v57 }
 0x32b   :  { %2481 = vmatpush3.bf16.msra.mxu0 %v674_v56  ;;  %2482 = vmatprep.mubr.msk.bf16.mxu0 %vm2779_vm1, %v2778_v15 }
 0x32c   :  { %2492 = vmatprep.subr.bf16.mxu0 %v2778_v15 }
 0x332   :  { %2483 = vmatmul.mubr.msk.bf16.vlgmr.msra.gmra.mrb[12].mxu0 %vm269_vm3, %v667_v58 }
 0x333   :  { %2496 = vmatprep.mubr.msk.bf16.mxu0 %vm2779_vm1, %v2778_v15 }
 0x3f3   :  { %v311_v3 = vpop.f32.mrb[0].mxu1 }
 0x3f4   :  { %v318_v6 = vmul.f32 0.35355338, %v311_v3  ;;  %v2448_v7 = vpop.f32.mrb[1].mxu1 }
 0x3f5   :  { %v314_v8 = vpop.f32.mrb[2].mxu1  ;;  %v440_v9 = vpop.f32.mrb[4].mxu0 }
 0x3f6   :  { %v319_v11 = vmul.f32 0.35355338, %v314_v8  ;;  %v2449_v12 = vpop.f32.mrb[3].mxu1  ;;  %v2460_v13 = vpop.f32.mrb[5].mxu0  ;;  %v320_v14 = vadd.f32 %v318_v6, %v2975_v5  ;;  %v447_v17 = vmul.f32 0.35355338, %v440_v9 }
 0x3f7   :  { %v443_v16 = vpop.f32.mrb[6].mxu0 }
 0x3f8   :  { %v448_v18 = vmul.f32 0.35355338, %v443_v16  ;;  %v2461_v19 = vpop.f32.mrb[7].mxu0  ;;  %v323_v20 = vsel %vm322_vm12, %v320_v14, -inf  ;;  %v321_v21 = vadd.f32 %v319_v11, %v2977_v10  ;;  %v449_v25 = vadd.f32 %v447_v17, %v2975_v5 }
 0x3f9   :  { %324 = vmax.xlane.f32.xlu0 %v323_v20 }
 0x3fa   :  { %v450_v22 = vadd.f32 %v448_v18, %v2977_v10  ;;  %v326_v23 = vsel %vm322_vm12, %v321_v21, -inf  ;;  %v451_v34 = vsel %vm322_vm12, %v449_v25, -inf }
 0x3fc   :  { %v454_v24 = vsel %vm322_vm12, %v450_v22, -inf }
 0x3fd   :  { %327 = vmax.xlane.f32.xlu0 %v326_v23  ;;  %455 = vmax.xlane.f32.xlu1 %v454_v24  ;;  %v574_v26 = vpop.f32.mrb[8].mxu0 }
 0x3fe   :  { %v581_v27 = vmul.f32 0.35355338, %v574_v26  ;;  %v2472_v28 = vpop.f32.mrb[9].mxu0 }
 0x3ff   :  { %v577_v29 = vpop.f32.mrb[10].mxu0 }
 0x400   :  { %v582_v30 = vmul.f32 0.35355338, %v577_v29  ;;  %v2473_v33 = vpop.f32.mrb[11].mxu0  ;;  %v583_v35 = vadd.f32 %v581_v27, %v2975_v5 }
 0x401   :  { %452 = vmax.xlane.f32.xlu0 %v451_v34 }
 0x402   :  { %v585_v36 = vsel %vm322_vm12, %v583_v35, -inf  ;;  %v584_v37 = vadd.f32 %v582_v30, %v2977_v10 }
 0x404   :  { %v588_v45 = vsel %vm322_vm12, %v584_v37, -inf }
 0x405   :  { %586 = vmax.xlane.f32.xlu0 %v585_v36  ;;  %v710_v38 = vpop.f32.mrb[12].mxu0 }
 0x406   :  { %v717_v39 = vmul.f32 0.35355338, %v710_v38  ;;  %v2484_v40 = vpop.f32.mrb[13].mxu0 }
 0x407   :  { %v713_v42 = vpop.f32.mrb[14].mxu0 }
 0x408   :  { %v718_v43 = vmul.f32 0.35355338, %v713_v42  ;;  %v2485_v44 = vpop.f32.mrb[15].mxu0  ;;  %v719_v46 = vadd.f32 %v717_v39, %v2975_v5 }
 0x409   :  { %589 = vmax.xlane.f32.xlu0 %v588_v45 }
 0x40a   :  { %v721_v47 = vsel %vm322_vm12, %v719_v46, -inf  ;;  %v720_v48 = vadd.f32 %v718_v43, %v2977_v10 }
 0x40c   :  { %v724_v49 = vsel %vm322_vm12, %v720_v48, -inf }
 0x40d   :  { %722 = vmax.xlane.f32.xlu0 %v721_v47 }
 0x40e   :  { %347 = vrot.lane.b32.xlu1 %v2942_v41, %s3361_s29 }
 0x411   :  { %725 = vmax.xlane.f32.xlu0 %v724_v49 }
 0x412   :  { %608 = vrot.lane.b32.xlu1 %v2942_v41, %s2787_s30 }
 0x416   :  { %744 = vrot.lane.b32.xlu1 %v2942_v41, %s2788_s0 }
 0x486   :  { %v325_v50 = vpop.xlane.xlu0 %324 }
 0x487   :  { %v329_v51 = vsub.f32 %v320_v14, %v325_v50 }
 0x489   :  { %v331_v52 = vmul.f32 1.442695, %v329_v51 }
 0x48a   :  { %v328_v53 = vpop.xlane.xlu0 %327  ;;  %v456_v54 = vpop.xlane.xlu1 %455 }
 0x48b   :  { %2664 = vpow2.f32 %v331_v52  ;;  %v330_v55 = vsub.f32 %v321_v21, %v328_v53  ;;  %v458_v57 = vsub.f32 %v450_v22, %v456_v54 }
 0x48d   :  { %v333_v56 = vmul.f32 1.442695, %v330_v55  ;;  %v461_v61 = vmul.f32 1.442695, %v458_v57 }
 0x48e   :  { %v453_v58 = vpop.xlane.xlu0 %452  ;;  %v348_v59 = vpop.permute.xlu1 %347 }
 0x48f   :  { %2666 = vpow2.f32 %v333_v56  ;;  %v457_v60 = vsub.f32 %v449_v25, %v453_v58  ;;  %2451 = vmatpush3.bf16.msra.mxu1 %v348_v59 }
 0x490   :  { %2462 = vmatprep.subr.bf16.mxu1 %v2778_v15 }
 0x491   :  { %v459_v62 = vmul.f32 1.442695, %v457_v60 }
 0x492   :  { %v587_v63 = vpop.xlane.xlu0 %586  ;;  %v609_v52 = vpop.permute.xlu1 %608 }
 0x493   :  { %2668 = vpow2.f32 %v459_v62  ;;  %v591_v0 = vsub.f32 %v583_v35, %v587_v63 }
 0x494   :  { %2670 = vpow2.f32 %v461_v61 }
 0x495   :  { %v2665_v1 = vpop.eup %2664  ;;  %v593_v2 = vmul.f32 1.442695, %v591_v0 }
 0x496   :  { %v590_v3 = vpop.xlane.xlu0 %589  ;;  %v335_v4 = vsel %vm322_vm12, %v2665_v1, 0.0  ;;  %v745_v58 = vpop.permute.xlu1 %744 }
 0x497   :  { %v592_v6 = vsub.f32 %v584_v37, %v590_v3  ;;  %336 = vadd.xlane.f32.xlu0 %v335_v4  ;;  %2672 = vpow2.f32 %v593_v2 }
 0x499   :  { %v2667_v7 = vpop.eup %2666  ;;  %v595_v8 = vmul.f32 1.442695, %v592_v6 }
 0x49a   :  { %v723_v9 = vpop.xlane.xlu0 %722  ;;  %v338_v11 = vsel %vm322_vm12, %v2667_v7, 0.0 }
 0x49b   :  { %v727_v12 = vsub.f32 %v719_v46, %v723_v9  ;;  %339 = vadd.xlane.f32.xlu0 %v338_v11  ;;  %2674 = vpow2.f32 %v595_v8  ;;  %v2638_v8 = vld [vmem:[%s3338_s6] sm:$0xff]   ;;  %v2639_v11 = vld [vmem:[%s3338_s6 + $0x8] sm:$0xff]  }
 0x49c   :  { %2493 = vmatpush3.bf16.msra.mxu0 %v2638_v8  ;;  %v2644_v8 = vld [vmem:[%s3344_s12 + $0x10] sm:$0xff]  }
 0x49d   :  { %v2669_v13 = vpop.eup %2668  ;;  %v729_v14 = vmul.f32 1.442695, %v727_v12  ;;  %2494 = vmatprep.subr.bf16.mxu0 %v2778_v15 }
 0x49e   :  { %v726_v16 = vpop.xlane.xlu0 %725  ;;  %v463_v17 = vsel %vm322_vm12, %v2669_v13, 0.0  ;;  %v2671_v18 = vpop.eup %2670 }
 0x49f   :  { %v728_v19 = vsub.f32 %v720_v48, %v726_v16  ;;  %464 = vadd.xlane.f32.xlu0 %v463_v17  ;;  %2676 = vpow2.f32 %v729_v14  ;;  %v466_v21 = vsel %vm322_vm12, %v2671_v18, 0.0 }
 0x4a0   :  { %2495 = vmatpush3.bf16.msra.mxu0 %v2639_v11  ;;  %v2292_v11 = vld [vmem:[%s3343_s11] ss:$0 sm:$0xff] }
 0x4a1   :  { %v731_v20 = vmul.f32 1.442695, %v728_v19  ;;  %v2673_v22 = vpop.eup %2672  ;;  %2508 = vmatprep.subr.bf16.mxu0 %v2778_v15 }
 0x4a2   :  { %v597_v23 = vsel %vm322_vm12, %v2673_v22, 0.0 }
 0x4a3   :  { %467 = vadd.xlane.f32.xlu0 %v466_v21  ;;  %2678 = vpow2.f32 %v731_v20 }
 0x4a5   :  { %v2675_v24 = vpop.eup %2674 }
 0x4a6   :  { %v600_v25 = vsel %vm322_vm12, %v2675_v24, 0.0 }
 0x4a7   :  { %598 = vadd.xlane.f32.xlu0 %v597_v23 }
 0x4a9   :  { %v2677_v26 = vpop.eup %2676 }
 0x4aa   :  { %v733_v27 = vsel %vm322_vm12, %v2677_v26, 0.0 }
 0x4ab   :  { %601 = vadd.xlane.f32.xlu0 %v600_v25 }
 0x4ad   :  { %v2679_v28 = vpop.eup %2678 }
 0x4ae   :  { %v736_v29 = vsel %vm322_vm12, %v2679_v28, 0.0 }
 0x4af   :  { %734 = vadd.xlane.f32.xlu0 %v733_v27 }
 0x4b3   :  { %737 = vadd.xlane.f32.xlu0 %v736_v29  ;;  %v2286_v29 = vld [vmem:[%s3339_s7] ss:$0 sm:$0xff] }
 0x4c9   :  { %474 = vrot.lane.b32.xlu0 %v2942_v41, %s2789_s21 }
 0x524   :  { %v337_v30 = vpop.xlane.xlu0 %336 }
 0x525   :  { %2680 = vrcp.f32 %v337_v30 }
 0x528   :  { %v340_v33 = vpop.xlane.xlu0 %339 }
 0x529   :  { %2682 = vrcp.f32 %v340_v33 }
 0x52c   :  { %v465_v34 = vpop.xlane.xlu0 %464 }
 0x52f   :  { %v2681_v36 = vpop.eup %2680 }
 0x530   :  { %v468_v35 = vpop.xlane.xlu0 %467  ;;  %v343_v38 = vmul.f32 %v2681_v36, %v2665_v1 }
 0x531   :  { %2684 = vrcp.f32 %v468_v35 }
 0x532   :  { %2686 = vrcp.f32 %v465_v34 }
 0x533   :  { %v2683_v37 = vpop.eup %2682 }
 0x534   :  { %v344_v39 = vmul.f32 %v2683_v37, %v2667_v7  ;;  %v599_v40 = vpop.xlane.xlu0 %598 }
 0x536   :  { %v345_v42 = vpack.c.bf16 %v344_v39, %v343_v38 }
 0x538   :  { %2453 = vmatmul.mubr.msk.bf16.vlgmr.msra.gmra.mrb[4].mxu1 %vm322_vm12, %v345_v42  ;;  %v602_v43 = vpop.xlane.xlu0 %601 }
 0x539   :  { %2464 = vmatprep.mubr.msk.bf16.mxu1 %vm2779_vm1, %v2778_v15  ;;  %2688 = vrcp.f32 %v602_v43 }
 0x53a   :  { %2690 = vrcp.f32 %v599_v40 }
 0x53b   :  { %v2685_v44 = vpop.eup %2684 }
 0x53c   :  { %v735_v41 = vpop.xlane.xlu0 %734  ;;  %v2687_v46 = vpop.eup %2686  ;;  %v472_v47 = vmul.f32 %v2685_v44, %v2671_v18 }
 0x53d   :  { %v471_v48 = vmul.f32 %v2687_v46, %v2669_v13 }
 0x53f   :  { %v473_v50 = vpack.c.bf16 %v472_v47, %v471_v48 }
 0x540   :  { %v738_v45 = vpop.xlane.xlu0 %737 }
 0x541   :  { %2692 = vrcp.f32 %v738_v45 }
 0x542   :  { %2694 = vrcp.f32 %v735_v41 }
 0x543   :  { %v2689_v51 = vpop.eup %2688 }
 0x544   :  { %v475_v49 = vpop.permute.xlu0 %474  ;;  %v2691_v53 = vpop.eup %2690  ;;  %v606_v54 = vmul.f32 %v2689_v51, %v2675_v24  ;;  %v2641_v51 = vld [vmem:[%s3342_s10 + $0x8] sm:$0xff]  }
 0x545   :  { %2463 = vmatpush3.bf16.msra.mxu1 %v475_v49  ;;  %v605_v55 = vmul.f32 %v2691_v53, %v2673_v22 }
 0x546   :  { %2474 = vmatprep.subr.bf16.mxu1 %v2778_v15 }
 0x547   :  { %v607_v56 = vpack.c.bf16 %v606_v54, %v605_v55 }
 0x548   :  { %2465 = vmatmul.mubr.msk.bf16.vlgmr.msra.gmra.mrb[8].mxu1 %vm322_vm12, %v473_v50 }
 0x549   :  { %2475 = vmatpush3.bf16.msra.mxu1 %v609_v52  ;;  %2476 = vmatprep.mubr.msk.bf16.mxu1 %vm2779_vm1, %v2778_v15 }
 0x54a   :  { %2486 = vmatprep.subr.bf16.mxu1 %v2778_v15 }
 0x54b   :  { %v2693_v57 = vpop.eup %2692 }
 0x54c   :  { %v2695_v59 = vpop.eup %2694  ;;  %v742_v60 = vmul.f32 %v2693_v57, %v2679_v28 }
 0x54d   :  { %v741_v61 = vmul.f32 %v2695_v59, %v2677_v26 }
 0x54f   :  { %v743_v62 = vpack.c.bf16 %v742_v60, %v741_v61  ;;  %v2290_v60 = vld [vmem:[%s3340_s8] ss:$0 sm:$0xff] }
 0x550   :  { %2477 = vmatmul.mubr.msk.bf16.vlgmr.msra.gmra.mrb[12].mxu1 %vm322_vm12, %v607_v56 }
 0x551   :  { %2487 = vmatpush3.bf16.msra.mxu1 %v745_v58  ;;  %2488 = vmatprep.mubr.msk.bf16.mxu1 %vm2779_vm1, %v2778_v15 }
 0x552   :  { %2500 = vmatprep.subr.bf16.mxu1 %v2778_v15 }
 0x558   :  { %2489 = vmatmul.mubr.msk.bf16.vlgmr.msra.gmra.mrb[16].mxu1 %vm322_vm12, %v743_v62 }
 0x559   :  { %2504 = vmatprep.mubr.msk.bf16.mxu1 %vm2779_vm1, %v2778_v15 }
 0x60b   :  { %v387_v63 = vpop.f32.mrb[4].mxu1 }
 0x60c   :  { %394 = vst.msk [vmem:[#allocation2] sm:$0xff] %vm269_vm3, %v387_v63  ;;  %v2454_v0 = vpop.f32.mrb[5].mxu1 }
 0x60d   :  { %v390_v1 = vpop.f32.mrb[6].mxu1  ;;  %v2291_v0 = vld [vmem:[%s3341_s9] ss:$0 sm:$0xff] }
 0x60e   :  { %395 = vst.msk [vmem:[#allocation2 + $0x8] sm:$0xff] %vm269_vm3, %v390_v1  ;;  %v2455_v2 = vpop.f32.mrb[7].mxu1 }
 0x61b   :  { %v514_v3 = vpop.f32.mrb[8].mxu1 }
 0x61c   :  { %523 = vrot.lane.b32.xlu1 %v514_v3, %s3359_s1  ;;  %v2466_v4 = vpop.f32.mrb[9].mxu1 }
 0x61d   :  { %v517_v6 = vpop.f32.mrb[10].mxu1 }
 0x61e   :  { %525 = vrot.lane.b32.xlu0 %v517_v6, %s3359_s1  ;;  %v2467_v7 = vpop.f32.mrb[11].mxu1  ;;  %v2642_v6 = vld [vmem:[%s3344_s12] sm:$0xff]  }
 0x61f   :  { %v2643_v7 = vld [vmem:[%s3344_s12 + $0x8] sm:$0xff]  }
 0x623   :  { %v648_v9 = vpop.f32.mrb[12].mxu1 }
 0x624   :  { %657 = vrot.lane.b32.xlu1 %v648_v9, %s3357_s4  ;;  %v2478_v12 = vpop.f32.mrb[13].mxu1  ;;  %v2645_v9 = vld [vmem:[%s3344_s12 + $0x18] sm:$0xff]  }
 0x625   :  { %v651_v13 = vpop.f32.mrb[14].mxu1 }
 0x626   :  { %659 = vrot.lane.b32.xlu0 %v651_v13, %s3357_s4  ;;  %v2479_v14 = vpop.f32.mrb[15].mxu1 }
 0x62b   :  { %v784_v16 = vpop.f32.mrb[16].mxu1 }
 0x62c   :  { %793 = vrot.lane.b32.xlu1 %v784_v16, %s3355_s22  ;;  %v2490_v17 = vpop.f32.mrb[17].mxu1 }
 0x62d   :  { %v787_v18 = vpop.f32.mrb[18].mxu1 }
 0x62e   :  { %795 = vrot.lane.b32.xlu0 %v787_v18, %s3355_s22  ;;  %v2491_v19 = vpop.f32.mrb[19].mxu1 }
 0x68e   :  { %v524_v20 = vpop.permute.xlu1 %523 }
 0x68f   :  { %530 = vst.msk [vmem:[#allocation2] sm:$0xff] %vm529_vm13, %v524_v20 }
 0x690   :  { %v526_v21 = vpop.permute.xlu0 %525 }
 0x691   :  { %531 = vst.msk [vmem:[#allocation2 + $0x8] sm:$0xff] %vm529_vm13, %v526_v21 }
 0x696   :  { %v658_v22 = vpop.permute.xlu1 %657 }
 0x697   :  { %664 = vst.msk [vmem:[#allocation2] sm:$0xff] %vm663_vm14, %v658_v22 }
 0x698   :  { %v660_v23 = vpop.permute.xlu0 %659 }
 0x699   :  { %665 = vst.msk [vmem:[#allocation2 + $0x8] sm:$0xff] %vm663_vm14, %v660_v23 }
 0x69e   :  { %v794_v24 = vpop.permute.xlu1 %793 }
 0x69f   :  { %800 = vst.msk [vmem:[#allocation2] sm:$0xff] %vm799_vm15, %v794_v24 }
 0x6a0   :  { %v796_v25 = vpop.permute.xlu0 %795 }
 0x6a1   :  { %801 = vst.msk [vmem:[#allocation2 + $0x8] sm:$0xff] %vm799_vm15, %v796_v25 }
 0x6a6   :  { %v802_v26 = vld [vmem:[#allocation2] sm:$0xff] }
 0x6a8   :  { %v803_v27 = vld [vmem:[#allocation2 + $0x8] sm:$0xff] }
 0x6a9   :  { %v808_v28 = vpack.c.bf16 %v803_v27, %v802_v26 }
 0x6ab   :  { %2497 = vmatmul.mubr.msk.bf16.vlgmr.msra.gmra.mrb[16].mxu0 %vm71_vm0, %v808_v28 }
 0x6ac   :  { %2516 = vmatprep.mubr.msk.bf16.mxu0 %vm2779_vm1, %v2778_v15  ;;  %2509 = vmatpush3.bf16.msra.mxu0 %v2642_v6 }
 0x6ad   :  { %2510 = vmatprep.subr.bf16.mxu0 %v2778_v15 }
 0x6b0   :  { %2511 = vmatpush3.bf16.msra.mxu0 %v2643_v7 }
 0x6b1   :  { %2512 = vmatprep.subr.bf16.mxu0 %v2778_v15 }
 0x6b4   :  { %2513 = vmatpush3.bf16.msra.mxu0 %v2644_v8 }
 0x6b5   :  { %2514 = vmatprep.subr.bf16.mxu0 %v2778_v15 }
 0x6b8   :  { %2515 = vmatpush3.bf16.msra.mxu0 %v2645_v9 }
 0x6b9   :  { %2534 = vmatprep.subr.bf16.mxu0 %v2778_v15 }
 0x77e   :  { %v865_v30 = vpop.f32.mrb[16].mxu0 }
 0x77f   :  { %v866_v33 = vadd.f32 %v2286_v29, %v865_v30  ;;  %v2498_v34 = vpop.f32.mrb[17].mxu0 }
 0x780   :  { %v868_v35 = vpop.f32.mrb[18].mxu0 }
 0x781   :  { %v869_v36 = vadd.f32 %v2286_v29, %v868_v35  ;;  %v2499_v37 = vpop.f32.mrb[19].mxu0  ;;  %v872_v38 = vadd.f32 %v866_v33, %v2929_v31 }
 0x783   :  { %v876_v39 = vsel %vm71_vm0, %v872_v38, 0.0  ;;  %v873_v40 = vadd.f32 %v869_v36, %v2931_v32  ;;  %v2640_v32 = vld [vmem:[%s3342_s10] sm:$0xff]  }
 0x784   :  { %877 = vadd.xlane.f32.xlu1 %v876_v39  ;;  %2501 = vmatpush3.bf16.msra.mxu1 %v2640_v32 }
 0x785   :  { %v879_v42 = vsel %vm71_vm0, %v873_v40, 0.0  ;;  %2502 = vmatprep.subr.bf16.mxu1 %v2778_v15 }
 0x786   :  { %880 = vadd.xlane.f32.xlu0 %v879_v42 }
 0x788   :  { %2503 = vmatpush3.bf16.msra.mxu1 %v2641_v51 }
 0x789   :  { %2520 = vmatprep.subr.bf16.mxu1 %v2778_v15 }
 0x811   :  { %v878_v43 = vpop.xlane.xlu1 %877 }
 0x812   :  { %v882_v41 = vmul.f32 0.03125, %v878_v43 }
 0x813   :  { %v881_v44 = vpop.xlane.xlu0 %880 }
 0x814   :  { %v884_v45 = vsub.f32 %v872_v38, %v882_v41  ;;  %v883_v46 = vmul.f32 0.03125, %v881_v44 }
 0x816   :  { %v885_v47 = vsub.f32 %v873_v40, %v883_v46  ;;  %v886_v48 = vmul.f32 %v884_v45, %v884_v45  ;;  %v2296_v40 = vld [vmem:[%s3345_s13] ss:$0 sm:$0xff] }
 0x818   :  { %v888_v49 = vsel %vm71_vm0, %v886_v48, 0.0  ;;  %v887_v50 = vmul.f32 %v885_v47, %v885_v47 }
 0x819   :  { %889 = vadd.xlane.f32.xlu0 %v888_v49 }
 0x81a   :  { %v891_v31 = vsel %vm71_vm0, %v887_v50, 0.0 }
 0x81d   :  { %892 = vadd.xlane.f32.xlu0 %v891_v31 }
 0x8a6   :  { %v890_v52 = vpop.xlane.xlu0 %889 }
 0x8a7   :  { %v894_v53 = vmul.f32 0.03125, %v890_v52 }
 0x8a9   :  { %v896_v54 = vadd.f32 1e-12, %v894_v53 }
 0x8aa   :  { %v893_v55 = vpop.xlane.xlu0 %892 }
 0x8ab   :  { %2696 = vrsqrt.f32 %v896_v54  ;;  %v895_v56 = vmul.f32 0.03125, %v893_v55 }
 0x8ad   :  { %v897_v57 = vadd.f32 1e-12, %v895_v56 }
 0x8af   :  { %2698 = vrsqrt.f32 %v897_v57 }
 0x8b5   :  { %v2697_v58 = vpop.eup %2696 }
 0x8b6   :  { %v900_v59 = vmul.f32 %v2697_v58, %v884_v45 }
 0x8b8   :  { %v908_v62 = vmul.f32 %v2290_v60, %v900_v59  ;;  %v2646_v59 = vld [vmem:[%s3368_s26 + $0x10] sm:$0xff]  }
 0x8b9   :  { %v2699_v61 = vpop.eup %2698 }
 0x8ba   :  { %v901_v63 = vmul.f32 %v2699_v61, %v885_v47  ;;  %v916_v2 = vadd.f32 %v2291_v0, %v908_v62 }
 0x8bc   :  { %v909_v1 = vmul.f32 %v2290_v60, %v901_v63  ;;  %v2647_v60 = vld [vmem:[%s3368_s26 + $0x18] sm:$0xff]  }
 0x8be   :  { %v917_v3 = vadd.f32 %v2291_v0, %v909_v1 }
 0x8c0   :  { %v922_v4 = vpack.c.bf16 %v917_v3, %v916_v2 }
 0x8c2   :  { %2505 = vmatmul.mubr.msk.bf16.vlgmr.msra.gmra.mrb[20].mxu1 %vm71_vm0, %v922_v4  ;;  %v2302_v4 = vld [vmem:[%s3346_s14] ss:$0 sm:$0xff] }
 0x8c3   :  { %2524 = vmatprep.mubr.msk.bf16.mxu1 %vm2779_vm1, %v2778_v15  ;;  %2521 = vmatpush3.bf16.msra.mxu1 %v2646_v59 }
 0x8c4   :  { %2522 = vmatprep.subr.bf16.mxu1 %v2778_v15 }
 0x8c7   :  { %2523 = vmatpush3.bf16.msra.mxu1 %v2647_v60 }
 0x8c8   :  { %2528 = vmatprep.subr.bf16.mxu1 %v2778_v15 }
 0x995   :  { %v979_v12 = vpop.f32.mrb[20].mxu1 }
 0x996   :  { %v980_v13 = vadd.f32 %v2292_v11, %v979_v12  ;;  %v2506_v14 = vpop.f32.mrb[21].mxu1 }
 0x997   :  { %v982_v16 = vpop.f32.mrb[22].mxu1 }
 0x998   :  { %v986_v17 = vmul.f32 %v980_v13, %v980_v13  ;;  %v983_v18 = vadd.f32 %v2292_v11, %v982_v16  ;;  %v2507_v19 = vpop.f32.mrb[23].mxu1  ;;  %v2303_v11 = vld [vmem:[%s3347_s15] ss:$0 sm:$0xff] }
 0x99a   :  { %v988_v20 = vmul.f32 %v986_v17, %v980_v13  ;;  %v987_v21 = vmul.f32 %v983_v18, %v983_v18  ;;  %v2309_v17 = vld [vmem:[%s3337_s5 + $0x1] ss:$0 sm:$0xff]  ;;  %s3372_s5 = smov 64  }
 0x99c   :  { %v990_v22 = vmul.f32 0.044715, %v988_v20  ;;  %v989_v23 = vmul.f32 %v987_v21, %v983_v18 }
 0x99e   :  { %v992_v24 = vadd.f32 %v990_v22, %v980_v13  ;;  %v991_v25 = vmul.f32 0.044715, %v989_v23 }
 0x9a0   :  { %v994_v26 = vmul.f32 0.7978846, %v992_v24  ;;  %v993_v27 = vadd.f32 %v991_v25, %v983_v18 }
 0x9a2   :  { %2700 = vtanh.f32 %v994_v26  ;;  %v995_v28 = vmul.f32 0.7978846, %v993_v27 }
 0x9a4   :  { %2702 = vtanh.f32 %v995_v28 }
 0x9ac   :  { %v2701_v29 = vpop.eup %2700 }
 0x9ad   :  { %v998_v30 = vadd.f32 1.0, %v2701_v29 }
 0x9ae   :  { %v2703_v33 = vpop.eup %2702 }
 0x9af   :  { %v1000_v34 = vmul.f32 0.5, %v998_v30  ;;  %v999_v35 = vadd.f32 1.0, %v2703_v33 }
 0x9b1   :  { %v1001_v36 = vmul.f32 0.5, %v999_v35  ;;  %v1002_v37 = vmul.f32 %v1000_v34, %v980_v13 }
 0x9b3   :  { %v1003_v38 = vmul.f32 %v1001_v36, %v983_v18 }
 0x9b5   :  { %v1012_v39 = vpack.c.bf16 %v1003_v38, %v1002_v37 }
 0x9b7   :  { %2517 = vmatmul.mubr.msk.bf16.vlgmr.msra.gmra.mrb[20].mxu0 %vm1044_vm4, %v1012_v39 }
 0x9b8   :  { %2536 = vmatprep.mubr.msk.bf16.mxu0 %vm2779_vm1, %v2778_v15 }
 0xa8a   :  { %v1082_v42 = vpop.f32.mrb[20].mxu0 }
 0xa8b   :  { %v1083_v43 = vadd.f32 %v2296_v40, %v1082_v42  ;;  %v2518_v41 = vpop.f32.mrb[21].mxu0 }
 0xa8c   :  { %v1085_v44 = vpop.f32.mrb[22].mxu0 }
 0xa8d   :  { %v1086_v45 = vadd.f32 %v2296_v40, %v1085_v44  ;;  %v2519_v46 = vpop.f32.mrb[23].mxu0  ;;  %v1089_v47 = vadd.f32 %v1083_v43, %v916_v2 }
 0xa8f   :  { %v1093_v48 = vsel %vm71_vm0, %v1089_v47, 0.0  ;;  %v1090_v49 = vadd.f32 %v1086_v45, %v917_v3 }
 0xa90   :  { %1094 = vadd.xlane.f32.xlu1 %v1093_v48 }
 0xa91   :  { %v1096_v50 = vsel %vm71_vm0, %v1090_v49, 0.0 }
 0xa92   :  { %1097 = vadd.xlane.f32.xlu0 %v1096_v50 }
 0xb1d   :  { %v1095_v31 = vpop.xlane.xlu1 %1094 }
 0xb1e   :  { %v1099_v32 = vmul.f32 0.03125, %v1095_v31 }
 0xb1f   :  { %v1098_v51 = vpop.xlane.xlu0 %1097 }
 0xb20   :  { %v1101_v52 = vsub.f32 %v1089_v47, %v1099_v32  ;;  %v1100_v53 = vmul.f32 0.03125, %v1098_v51 }
 0xb22   :  { %v1102_v54 = vsub.f32 %v1090_v49, %v1100_v53  ;;  %v1103_v55 = vmul.f32 %v1101_v52, %v1101_v52 }
 0xb24   :  { %v1105_v56 = vsel %vm71_vm0, %v1103_v55, 0.0  ;;  %v1104_v57 = vmul.f32 %v1102_v54, %v1102_v54 }
 0xb25   :  { %1106 = vadd.xlane.f32.xlu1 %v1105_v56 }
 0xb26   :  { %v1108_v58 = vsel %vm71_vm0, %v1104_v57, 0.0 }
 0xb27   :  { %1109 = vadd.xlane.f32.xlu0 %v1108_v58 }
 0xbb2   :  { %v1107_v61 = vpop.xlane.xlu1 %1106 }
 0xbb3   :  { %v1111_v62 = vmul.f32 0.03125, %v1107_v61 }
 0xbb4   :  { %v1110_v63 = vpop.xlane.xlu0 %1109 }
 0xbb5   :  { %v1113_v0 = vadd.f32 1e-12, %v1111_v62  ;;  %v1112_v1 = vmul.f32 0.03125, %v1110_v63 }
 0xbb7   :  { %2704 = vrsqrt.f32 %v1113_v0  ;;  %v1114_v2 = vadd.f32 1e-12, %v1112_v1 }
 0xbb9   :  { %2706 = vrsqrt.f32 %v1114_v2 }
 0xbc1   :  { %v2705_v3 = vpop.eup %2704 }
 0xbc2   :  { %v1117_v6 = vmul.f32 %v2705_v3, %v1101_v52 }
 0xbc3   :  { %v2707_v7 = vpop.eup %2706 }
 0xbc4   :  { %v1125_v8 = vmul.f32 %v2302_v4, %v1117_v6  ;;  %v1118_v9 = vmul.f32 %v2707_v7, %v1102_v54 }
 0xbc6   :  { %v1126_v12 = vmul.f32 %v2302_v4, %v1118_v9  ;;  %v3121_v13 = vadd.f32 %v2303_v11, %v1125_v8 }
 0xbc8   :  { %v3123_v14 = vadd.f32 %v2303_v11, %v1126_v12 }
 0xbca   :  { %v1140_v16 = vpack.c.bf16 %v3123_v14, %v3121_v13 }
 0xbcc   :  { %2525 = vmatmul.mubr.msk.bf16.vlgmr.msra.gmra.mrb[24].mxu1 %vm71_vm0, %v1140_v16 }
 0xbcd   :  { %2530 = vmatprep.mubr.msk.bf16.mxu1 %vm2779_vm1, %v2778_v15 }
 0xc9f   :  { %v1198_v18 = vpop.f32.mrb[24].mxu1 }
 0xca0   :  { %v1199_v19 = vadd.f32 %v2309_v17, %v1198_v18  ;;  %v2526_v20 = vpop.f32.mrb[25].mxu1 }
 0xca1   :  { %v1201_v21 = vpop.f32.mrb[26].mxu1 }
 0xca2   :  { %v1202_v22 = vadd.f32 %v2309_v17, %v1201_v21  ;;  %1208 = vrot.lane.b32.xlu1 %v1199_v19, %s2780_s24  ;;  %v2527_v23 = vpop.f32.mrb[27].mxu1 }
 0xca4   :  { %v3134_v24 = vpack.c.bf16 %v1202_v22, %v1199_v19  ;;  %1210 = vrot.lane.b32.xlu0 %v1202_v22, %s2780_s24  ;;  %s3373_s24 = smov 8  }
 0xca6   :  { %1372 = vrot.lane.b32.xlu1 %v3134_v24, %s2782_s25 }
 0xca8   :  { %1507 = vrot.lane.b32.xlu0 %v3134_v24, %s2781_s2 }
 0xcac   :  { %1640 = vrot.lane.b32.xlu0 %v3134_v24, %s2783_s3 }
 0xd14   :  { %v1209_v25 = vpop.permute.xlu1 %1208 }
 0xd15   :  { %1214 = vxpose.xlu1.b32.start [1/2] (short) (narrow) %v1209_v25, 32 }
 0xd16   :  { %v1211_v26 = vpop.permute.xlu0 %1210 }
 0xd18   :  { %v1373_v27 = vpop.permute.xlu1 %1372 }
 0xd19   :  { %1215 = vxpose.xlu1.b32.end [2/2] (short) (narrow) %v1211_v26, 32 }
 0xd1a   :  { %v1508_v42 = vpop.permute.xlu0 %1507 }
 0xd1e   :  { %v1641_v41 = vpop.permute.xlu0 %1640 }
 0xd95   :  { %v1230_v28 = vpop.trf.xlu1 }
 0xd99   :  { %v1231_v29 = vpop.trf.xlu1 }
 0xd9a   :  { %v1246_v30 = vpack.c.bf16 %v1231_v29, %v1230_v28 }
 0xd9c   :  { %v1252_v33 = vsel %vm273_vm2, %v1246_v30, 0  ;;  %v1375_v34 = vrot.slane %v1246_v30, 4 }
 0xd9d   :  { %2529 = vmatpush3.bf16.msra.mxu1 %v1252_v33  ;;  %v1232_v35 = vpop.trf.xlu1 }
 0xd9e   :  { %2540 = vmatprep.subr.bf16.mxu1 %v2778_v15  ;;  %v1380_v36 = vsel %vm273_vm2, %v1375_v34, 0 }
 0xda0   :  { %2531 = vmatmul.mubr.msk.bf16.vlgmr.msra.gmra.mrb[28].mxu1 %vm269_vm3, %v3134_v24 }
 0xda1   :  { %2541 = vmatpush3.bf16.msra.mxu1 %v1380_v36  ;;  %v1233_v37 = vpop.trf.xlu1  ;;  %2542 = vmatprep.mubr.msk.bf16.mxu1 %vm2779_vm1, %v2778_v15 }
 0xda2   :  { %v1247_v38 = vpack.c.bf16 %v1233_v37, %v1232_v35  ;;  %2552 = vmatprep.subr.bf16.mxu1 %v2778_v15 }
 0xda4   :  { %v1513_v39 = vsel %vm273_vm2, %v1247_v38, 0  ;;  %v1643_v40 = vrot.slane %v1247_v38, 4 }
 0xda6   :  { %v1648_v43 = vsel %vm273_vm2, %v1643_v40, 0  ;;  %vm2120_vm2 = vcmask 1040384  }
 0xda8   :  { %2543 = vmatmul.mubr.msk.bf16.vlgmr.msra.gmra.mrb[32].mxu1 %vm269_vm3, %v1373_v27 }
 0xda9   :  { %2553 = vmatpush3.bf16.msra.mxu1 %v1513_v39  ;;  %2554 = vmatprep.mubr.msk.bf16.mxu1 %vm2779_vm1, %v2778_v15 }
 0xdaa   :  { %2564 = vmatprep.subr.bf16.mxu1 %v2778_v15 }
 0xdb0   :  { %2555 = vmatmul.mubr.msk.bf16.vlgmr.msra.gmra.mrb[36].mxu1 %vm269_vm3, %v1508_v42 }
 0xdb1   :  { %2565 = vmatpush3.bf16.msra.mxu1 %v1648_v43  ;;  %2566 = vmatprep.mubr.msk.bf16.mxu1 %vm2779_vm1, %v2778_v15 }
 0xdb2   :  { %2576 = vmatprep.subr.bf16.mxu1 %v2778_v15 }
 0xdb8   :  { %2567 = vmatmul.mubr.msk.bf16.vlgmr.msra.gmra.mrb[40].mxu1 %vm269_vm3, %v1641_v41 }
 0xdb9   :  { %2580 = vmatprep.mubr.msk.bf16.mxu1 %vm2779_vm1, %v2778_v15 }
 0xe73   :  { %v1288_v44 = vpop.f32.mrb[28].mxu1 }
 0xe74   :  { %v1295_v45 = vmul.f32 0.35355338, %v1288_v44  ;;  %v2532_v46 = vpop.f32.mrb[29].mxu1 }
 0xe75   :  { %v1291_v47 = vpop.f32.mrb[30].mxu1 }
 0xe76   :  { %v1296_v48 = vmul.f32 0.35355338, %v1291_v47  ;;  %v2533_v49 = vpop.f32.mrb[31].mxu1  ;;  %v1297_v50 = vadd.f32 %v1295_v45, %v2975_v5 }
 0xe78   :  { %v1299_v31 = vsel %vm322_vm12, %v1297_v50, -inf  ;;  %v1298_v32 = vadd.f32 %v1296_v48, %v2977_v10 }
 0xe79   :  { %1300 = vmax.xlane.f32.xlu0 %v1299_v31 }
 0xe7a   :  { %v1302_v54 = vsel %vm322_vm12, %v1298_v32, -inf }
 0xe7b   :  { %v1416_v51 = vpop.f32.mrb[32].mxu1 }
 0xe7c   :  { %v1423_v52 = vmul.f32 0.35355338, %v1416_v51  ;;  %v2544_v53 = vpop.f32.mrb[33].mxu1 }
 0xe7d   :  { %1303 = vmax.xlane.f32.xlu0 %v1302_v54  ;;  %v1419_v55 = vpop.f32.mrb[34].mxu1 }
 0xe7e   :  { %v1424_v56 = vmul.f32 0.35355338, %v1419_v55  ;;  %v2545_v57 = vpop.f32.mrb[35].mxu1  ;;  %v1425_v58 = vadd.f32 %v1423_v52, %v2975_v5 }
 0xe80   :  { %v1427_v59 = vsel %vm322_vm12, %v1425_v58, -inf  ;;  %v1426_v60 = vadd.f32 %v1424_v56, %v2977_v10 }
 0xe81   :  { %1428 = vmax.xlane.f32.xlu1 %v1427_v59 }
 0xe82   :  { %v1430_v61 = vsel %vm322_vm12, %v1426_v60, -inf }
 0xe83   :  { %1431 = vmax.xlane.f32.xlu0 %v1430_v61  ;;  %v1549_v62 = vpop.f32.mrb[36].mxu1 }
 0xe84   :  { %v1556_v63 = vmul.f32 0.35355338, %v1549_v62  ;;  %v2556_v0 = vpop.f32.mrb[37].mxu1 }
 0xe85   :  { %v1552_v1 = vpop.f32.mrb[38].mxu1 }
 0xe86   :  { %v1557_v2 = vmul.f32 0.35355338, %v1552_v1  ;;  %v2557_v3 = vpop.f32.mrb[39].mxu1  ;;  %v1558_v4 = vadd.f32 %v1556_v63, %v2975_v5 }
 0xe88   :  { %v1560_v6 = vsel %vm322_vm12, %v1558_v4, -inf  ;;  %v1559_v7 = vadd.f32 %v1557_v2, %v2977_v10 }
 0xe89   :  { %1561 = vmax.xlane.f32.xlu0 %v1560_v6 }
 0xe8a   :  { %v1563_v12 = vsel %vm322_vm12, %v1559_v7, -inf }
 0xe8b   :  { %v1684_v8 = vpop.f32.mrb[40].mxu1 }
 0xe8c   :  { %v1691_v9 = vmul.f32 0.35355338, %v1684_v8  ;;  %v2568_v11 = vpop.f32.mrb[41].mxu1 }
 0xe8d   :  { %1564 = vmax.xlane.f32.xlu0 %v1563_v12  ;;  %v1687_v16 = vpop.f32.mrb[42].mxu1 }
 0xe8e   :  { %v1692_v17 = vmul.f32 0.35355338, %v1687_v16  ;;  %v2569_v18 = vpop.f32.mrb[43].mxu1  ;;  %v1693_v19 = vadd.f32 %v1691_v9, %v2975_v5 }
 0xe90   :  { %v1695_v20 = vsel %vm322_vm12, %v1693_v19, -inf  ;;  %v1694_v21 = vadd.f32 %v1692_v17, %v2977_v10 }
 0xe91   :  { %1696 = vmax.xlane.f32.xlu0 %v1695_v20 }
 0xe92   :  { %1450 = vrot.lane.b32.xlu1 %v3134_v24, %s2789_s21  ;;  %v1698_v22 = vsel %vm322_vm12, %v1694_v21, -inf  ;;  %s3375_s21 = smov 24  }
 0xe95   :  { %1699 = vmax.xlane.f32.xlu0 %v1698_v22 }
 0xe96   :  { %1583 = vrot.lane.b32.xlu1 %v3134_v24, %s2787_s30 }
 0xf06   :  { %v1301_v23 = vpop.xlane.xlu0 %1300 }
 0xf07   :  { %v1305_v25 = vsub.f32 %v1297_v50, %v1301_v23 }
 0xf09   :  { %v1307_v26 = vmul.f32 1.442695, %v1305_v25 }
 0xf0a   :  { %v1304_v27 = vpop.xlane.xlu0 %1303 }
 0xf0b   :  { %2708 = vpow2.f32 %v1307_v26  ;;  %v1306_v5 = vsub.f32 %v1298_v32, %v1304_v27 }
 0xf0d   :  { %v1309_v28 = vmul.f32 1.442695, %v1306_v5 }
 0xf0e   :  { %v1429_v29 = vpop.xlane.xlu1 %1428 }
 0xf0f   :  { %2710 = vpow2.f32 %v1309_v28  ;;  %v1433_v10 = vsub.f32 %v1425_v58, %v1429_v29 }
 0xf10   :  { %v1432_v30 = vpop.xlane.xlu0 %1431 }
 0xf11   :  { %v1435_v33 = vmul.f32 1.442695, %v1433_v10  ;;  %v1434_v34 = vsub.f32 %v1426_v60, %v1432_v30 }
 0xf12   :  { %v1451_v6 = vpop.permute.xlu1 %1450 }
 0xf13   :  { %2712 = vpow2.f32 %v1435_v33  ;;  %v1437_v35 = vmul.f32 1.442695, %v1434_v34 }
 0xf15   :  { %v2709_v36 = vpop.eup %2708  ;;  %2714 = vpow2.f32 %v1437_v35 }
 0xf16   :  { %v1562_v37 = vpop.xlane.xlu0 %1561  ;;  %v1311_v38 = vsel %vm322_vm12, %v2709_v36, 0.0 }
 0xf17   :  { %v1566_v39 = vsub.f32 %v1558_v4, %v1562_v37  ;;  %1312 = vadd.xlane.f32.xlu0 %v1311_v38 }
 0xf19   :  { %v2711_v40 = vpop.eup %2710  ;;  %v1568_v42 = vmul.f32 1.442695, %v1566_v39 }
 0xf1a   :  { %v1565_v43 = vpop.xlane.xlu0 %1564  ;;  %v1314_v41 = vsel %vm322_vm12, %v2711_v40, 0.0 }
 0xf1b   :  { %2716 = vpow2.f32 %v1568_v42  ;;  %v1567_v44 = vsub.f32 %v1559_v7, %v1565_v43  ;;  %1315 = vadd.xlane.f32.xlu0 %v1314_v41  ;;  %v2648_v41 = vld [vmem:[%s3338_s6 + $0x10] sm:$0xff]  }
 0xf1c   :  { %2577 = vmatpush3.bf16.msra.mxu1 %v2648_v41  ;;  %v2339_v41 = vld [vmem:[%s3343_s11 + $0x1] ss:$0 sm:$0xff] }
 0xf1d   :  { %v2713_v45 = vpop.eup %2712  ;;  %v1570_v46 = vmul.f32 1.442695, %v1567_v44  ;;  %2578 = vmatprep.subr.bf16.mxu1 %v2778_v15 }
 0xf1e   :  { %v1697_v47 = vpop.xlane.xlu0 %1696  ;;  %v1439_v48 = vsel %vm322_vm12, %v2713_v45, 0.0 }
 0xf1f   :  { %v2715_v49 = vpop.eup %2714  ;;  %2718 = vpow2.f32 %v1570_v46  ;;  %v1701_v50 = vsub.f32 %v1693_v19, %v1697_v47  ;;  %1440 = vadd.xlane.f32.xlu0 %v1439_v48 }
 0xf20   :  { %v1442_v51 = vsel %vm322_vm12, %v2715_v49, 0.0 }
 0xf21   :  { %v1703_v31 = vmul.f32 1.442695, %v1701_v50 }
 0xf22   :  { %v1700_v32 = vpop.xlane.xlu0 %1699 }
 0xf23   :  { %2720 = vpow2.f32 %v1703_v31  ;;  %v1702_v52 = vsub.f32 %v1694_v21, %v1700_v32  ;;  %1443 = vadd.xlane.f32.xlu0 %v1442_v51 }
 0xf25   :  { %v2717_v53 = vpop.eup %2716  ;;  %v1705_v54 = vmul.f32 1.442695, %v1702_v52 }
 0xf26   :  { %v1572_v55 = vsel %vm322_vm12, %v2717_v53, 0.0 }
 0xf27   :  { %2722 = vpow2.f32 %v1705_v54  ;;  %1573 = vadd.xlane.f32.xlu0 %v1572_v55 }
 0xf29   :  { %v2719_v56 = vpop.eup %2718 }
 0xf2a   :  { %v1575_v57 = vsel %vm322_vm12, %v2719_v56, 0.0 }
 0xf2b   :  { %1576 = vadd.xlane.f32.xlu0 %v1575_v57 }
 0xf2d   :  { %v2721_v58 = vpop.eup %2720 }
 0xf2e   :  { %v1707_v59 = vsel %vm322_vm12, %v2721_v58, 0.0 }
 0xf2f   :  { %1708 = vadd.xlane.f32.xlu0 %v1707_v59 }
 0xf31   :  { %v2723_v60 = vpop.eup %2722 }
 0xf32   :  { %v1710_v61 = vsel %vm322_vm12, %v2723_v60, 0.0 }
 0xf33   :  { %1711 = vadd.xlane.f32.xlu1 %v1710_v61 }
 0xf44   :  { %1718 = vrot.lane.b32.xlu1 %v3134_v24, %s2788_s0  ;;  %s3374_s0 = smov 16  }
 0xf45   :  { %1323 = vrot.lane.b32.xlu0 %v3134_v24, %s3372_s5  ;;  %v1584_v24 = vpop.permute.xlu1 %1583 }
 0xfa4   :  { %v1313_v62 = vpop.xlane.xlu0 %1312 }
 0xfa8   :  { %v1316_v63 = vpop.xlane.xlu0 %1315 }
 0xfa9   :  { %2724 = vrcp.f32 %v1316_v63 }
 0xfaa   :  { %2726 = vrcp.f32 %v1313_v62 }
 0xfac   :  { %v1441_v0 = vpop.xlane.xlu0 %1440 }
 0xfb0   :  { %v1444_v1 = vpop.xlane.xlu0 %1443 }
 0xfb1   :  { %2728 = vrcp.f32 %v1444_v1 }
 0xfb2   :  { %2730 = vrcp.f32 %v1441_v0 }
 0xfb3   :  { %v2725_v4 = vpop.eup %2724 }
 0xfb4   :  { %v1574_v2 = vpop.xlane.xlu0 %1573  ;;  %v2727_v8 = vpop.eup %2726  ;;  %v1320_v9 = vmul.f32 %v2725_v4, %v2711_v40 }
 0xfb5   :  { %v1319_v11 = vmul.f32 %v2727_v8, %v2709_v36 }
 0xfb7   :  { %v1321_v16 = vpack.c.bf16 %v1320_v9, %v1319_v11 }
 0xfb8   :  { %v1577_v3 = vpop.xlane.xlu0 %1576 }
 0xfb9   :  { %2732 = vrcp.f32 %v1577_v3 }
 0xfba   :  { %2734 = vrcp.f32 %v1574_v2 }
 0xfbb   :  { %v2729_v17 = vpop.eup %2728 }
 0xfbc   :  { %v1709_v7 = vpop.xlane.xlu0 %1708  ;;  %v2731_v18 = vpop.eup %2730  ;;  %v1448_v19 = vmul.f32 %v2729_v17, %v2715_v49 }
 0xfbd   :  { %v1447_v21 = vmul.f32 %v2731_v18, %v2713_v45  ;;  %v2649_v45 = vld [vmem:[%s3338_s6 + $0x18] sm:$0xff]  }
 0xfbe   :  { %2579 = vmatpush3.bf16.msra.mxu1 %v2649_v45 }
 0xfbf   :  { %v1449_v22 = vpack.c.bf16 %v1448_v19, %v1447_v21  ;;  %2592 = vmatprep.subr.bf16.mxu1 %v2778_v15 }
 0xfc0   :  { %v1324_v12 = vpop.permute.xlu0 %1323  ;;  %v1712_v20 = vpop.xlane.xlu1 %1711 }
 0xfc1   :  { %2535 = vmatpush3.bf16.msra.mxu0 %v1324_v12  ;;  %2736 = vrcp.f32 %v1712_v20  ;;  %v2651_v20 = vld [vmem:[%s3342_s10 + $0x18] sm:$0xff]  }
 0xfc2   :  { %2546 = vmatprep.subr.bf16.mxu0 %v2778_v15  ;;  %2738 = vrcp.f32 %v1709_v7 }
 0xfc3   :  { %v2733_v23 = vpop.eup %2732 }
 0xfc4   :  { %2537 = vmatmul.mubr.msk.bf16.vlgmr.msra.gmra.mrb[24].mxu0 %vm322_vm12, %v1321_v16  ;;  %v2735_v25 = vpop.eup %2734  ;;  %v1581_v26 = vmul.f32 %v2733_v23, %v2719_v56  ;;  %v1719_v29 = vpop.permute.xlu1 %1718 }
 0xfc5   :  { %2547 = vmatpush3.bf16.msra.mxu0 %v1451_v6  ;;  %2548 = vmatprep.mubr.msk.bf16.mxu0 %vm2779_vm1, %v2778_v15  ;;  %v1580_v27 = vmul.f32 %v2735_v25, %v2717_v53 }
 0xfc6   :  { %2558 = vmatprep.subr.bf16.mxu0 %v2778_v15 }
 0xfc7   :  { %v1582_v5 = vpack.c.bf16 %v1581_v26, %v1580_v27 }
 0xfcb   :  { %v2737_v28 = vpop.eup %2736 }
 0xfcc   :  { %2549 = vmatmul.mubr.msk.bf16.vlgmr.msra.gmra.mrb[28].mxu0 %vm322_vm12, %v1449_v22  ;;  %v2739_v10 = vpop.eup %2738  ;;  %v1716_v30 = vmul.f32 %v2737_v28, %v2723_v60  ;;  %v2326_v60 = vld [vmem:[%s3339_s7 + $0x1] ss:$0 sm:$0xff] }
 0xfcd   :  { %2559 = vmatpush3.bf16.msra.mxu0 %v1584_v24  ;;  %2560 = vmatprep.mubr.msk.bf16.mxu0 %vm2779_vm1, %v2778_v15  ;;  %v1715_v33 = vmul.f32 %v2739_v10, %v2721_v58 }
 0xfce   :  { %2570 = vmatprep.subr.bf16.mxu0 %v2778_v15 }
 0xfcf   :  { %v1717_v34 = vpack.c.bf16 %v1716_v30, %v1715_v33 }
 0xfd4   :  { %2561 = vmatmul.mubr.msk.bf16.vlgmr.msra.gmra.mrb[32].mxu0 %vm322_vm12, %v1582_v5 }
 0xfd5   :  { %2571 = vmatpush3.bf16.msra.mxu0 %v1719_v29  ;;  %2572 = vmatprep.mubr.msk.bf16.mxu0 %vm2779_vm1, %v2778_v15  ;;  %v2332_v29 = vld [vmem:[%s3340_s8 + $0x1] ss:$0 sm:$0xff] }
 0xfd6   :  { %2584 = vmatprep.subr.bf16.mxu0 %v2778_v15 }
 0xfdc   :  { %2573 = vmatmul.mubr.msk.bf16.vlgmr.msra.gmra.mrb[36].mxu0 %vm322_vm12, %v1717_v34  ;;  %v2333_v34 = vld [vmem:[%s3341_s9 + $0x1] ss:$0 sm:$0xff] }
 0xfdd   :  { %2588 = vmatprep.mubr.msk.bf16.mxu0 %vm2779_vm1, %v2778_v15 }
0x1097   :  { %v1363_v35 = vpop.f32.mrb[24].mxu0 }
0x1098   :  { %1370 = vst.msk [vmem:[#allocation2] sm:$0xff] %vm269_vm3, %v1363_v35  ;;  %v2538_v36 = vpop.f32.mrb[25].mxu0 }
0x1099   :  { %v1366_v37 = vpop.f32.mrb[26].mxu0 }
0x109a   :  { %1371 = vst.msk [vmem:[#allocation2 + $0x8] sm:$0xff] %vm269_vm3, %v1366_v37  ;;  %v2539_v38 = vpop.f32.mrb[27].mxu0 }
0x109f   :  { %v1490_v39 = vpop.f32.mrb[28].mxu0 }
0x10a0   :  { %1499 = vrot.lane.b32.xlu0 %v1490_v39, %s3373_s24  ;;  %v2550_v40 = vpop.f32.mrb[29].mxu0  ;;  %v2652_v39 = vld [vmem:[%s3344_s12 + $0x20] sm:$0xff]  }
0x10a1   :  { %v1493_v42 = vpop.f32.mrb[30].mxu0  ;;  %v2653_v40 = vld [vmem:[%s3344_s12 + $0x28] sm:$0xff]  }
0x10a2   :  { %1501 = vrot.lane.b32.xlu1 %v1493_v42, %s3373_s24  ;;  %v2551_v43 = vpop.f32.mrb[31].mxu0  ;;  %v2654_v42 = vld [vmem:[%s3344_s12 + $0x30] sm:$0xff]  }
0x10a3   :  { %v2655_v43 = vld [vmem:[%s3344_s12 + $0x38] sm:$0xff]  }
0x10a7   :  { %v1623_v44 = vpop.f32.mrb[32].mxu0 }
0x10a8   :  { %1632 = vrot.lane.b32.xlu0 %v1623_v44, %s3374_s0  ;;  %v2562_v46 = vpop.f32.mrb[33].mxu0 }
0x10a9   :  { %v1626_v47 = vpop.f32.mrb[34].mxu0 }
0x10aa   :  { %1634 = vrot.lane.b32.xlu1 %v1626_v47, %s3374_s0  ;;  %v2563_v48 = vpop.f32.mrb[35].mxu0 }
0x10af   :  { %v1758_v49 = vpop.f32.mrb[36].mxu0 }
0x10b0   :  { %1767 = vrot.lane.b32.xlu0 %v1758_v49, %s3375_s21  ;;  %v2574_v50 = vpop.f32.mrb[37].mxu0 }
0x10b1   :  { %v1761_v31 = vpop.f32.mrb[38].mxu0 }
0x10b2   :  { %1769 = vrot.lane.b32.xlu1 %v1761_v31, %s3375_s21  ;;  %v2575_v32 = vpop.f32.mrb[39].mxu0 }
0x1112   :  { %v1500_v51 = vpop.permute.xlu0 %1499 }
0x1113   :  { %1505 = vst.msk [vmem:[#allocation2] sm:$0xff] %vm529_vm13, %v1500_v51 }
0x1114   :  { %v1502_v52 = vpop.permute.xlu1 %1501 }
0x1115   :  { %1506 = vst.msk [vmem:[#allocation2 + $0x8] sm:$0xff] %vm529_vm13, %v1502_v52 }
0x111a   :  { %v1633_v53 = vpop.permute.xlu0 %1632 }
0x111b   :  { %1638 = vst.msk [vmem:[#allocation2] sm:$0xff] %vm663_vm14, %v1633_v53 }
0x111c   :  { %v1635_v54 = vpop.permute.xlu1 %1634 }
0x111d   :  { %1639 = vst.msk [vmem:[#allocation2 + $0x8] sm:$0xff] %vm663_vm14, %v1635_v54 }
0x1122   :  { %v1768_v55 = vpop.permute.xlu0 %1767 }
0x1123   :  { %1773 = vst.msk [vmem:[#allocation2] sm:$0xff] %vm799_vm15, %v1768_v55 }
0x1124   :  { %v1770_v56 = vpop.permute.xlu1 %1769 }
0x1125   :  { %1774 = vst.msk [vmem:[#allocation2 + $0x8] sm:$0xff] %vm799_vm15, %v1770_v56 }
0x112a   :  { %v1775_v57 = vld [vmem:[#allocation2] sm:$0xff] }
0x112c   :  { %v1776_v58 = vld [vmem:[#allocation2 + $0x8] sm:$0xff] }
0x112d   :  { %v1782_v59 = vpack.c.bf16 %v1776_v58, %v1775_v57 }
0x112f   :  { %2581 = vmatmul.mubr.msk.bf16.vlgmr.msra.gmra.mrb[44].mxu1 %vm71_vm0, %v1782_v59 }
0x1130   :  { %2600 = vmatprep.mubr.msk.bf16.mxu1 %vm2779_vm1, %v2778_v15  ;;  %2593 = vmatpush3.bf16.msra.mxu1 %v2652_v39 }
0x1131   :  { %2594 = vmatprep.subr.bf16.mxu1 %v2778_v15 }
0x1134   :  { %2595 = vmatpush3.bf16.msra.mxu1 %v2653_v40 }
0x1135   :  { %2596 = vmatprep.subr.bf16.mxu1 %v2778_v15 }
0x1138   :  { %2597 = vmatpush3.bf16.msra.mxu1 %v2654_v42 }
0x1139   :  { %2598 = vmatprep.subr.bf16.mxu1 %v2778_v15 }
0x113c   :  { %2599 = vmatpush3.bf16.msra.mxu1 %v2655_v43  ;;  %v2361_v43 = vld [vmem:[%s3347_s15 + $0x1] ss:$0 sm:$0xff] }
0x1202   :  { %v1840_v61 = vpop.f32.mrb[44].mxu1 }
0x1203   :  { %v1841_v62 = vadd.f32 %v2326_v60, %v1840_v61  ;;  %v2582_v63 = vpop.f32.mrb[45].mxu1 }
0x1204   :  { %v1843_v0 = vpop.f32.mrb[46].mxu1 }
0x1205   :  { %v1847_v1 = vadd.f32 %v1841_v62, %v3121_v13  ;;  %v1844_v2 = vadd.f32 %v2326_v60, %v1843_v0  ;;  %v2583_v3 = vpop.f32.mrb[47].mxu1 }
0x1206   :  { %v2352_v3 = vld [vmem:[%s3345_s13 + $0x1] ss:$0 sm:$0xff] }
0x1207   :  { %v1853_v4 = vsel %vm71_vm0, %v1847_v1, 0.0  ;;  %v1848_v6 = vadd.f32 %v1844_v2, %v3123_v14  ;;  %v2650_v14 = vld [vmem:[%s3342_s10 + $0x10] sm:$0xff]  }
0x1208   :  { %1854 = vadd.xlane.f32.xlu0 %v1853_v4  ;;  %2585 = vmatpush3.bf16.msra.mxu0 %v2650_v14 }
0x1209   :  { %v1856_v7 = vsel %vm71_vm0, %v1848_v6, 0.0  ;;  %2586 = vmatprep.subr.bf16.mxu0 %v2778_v15 }
0x120a   :  { %1857 = vadd.xlane.f32.xlu1 %v1856_v7 }
0x120c   :  { %2587 = vmatpush3.bf16.msra.mxu0 %v2651_v20 }
0x120d   :  { %2604 = vmatprep.subr.bf16.mxu0 %v2778_v15 }
0x1295   :  { %v1855_v8 = vpop.xlane.xlu0 %1854 }
0x1296   :  { %v1859_v9 = vmul.f32 0.03125, %v1855_v8 }
0x1297   :  { %v1858_v11 = vpop.xlane.xlu1 %1857 }
0x1298   :  { %v1861_v12 = vsub.f32 %v1847_v1, %v1859_v9  ;;  %v1860_v24 = vmul.f32 0.03125, %v1858_v11 }
0x129a   :  { %v1862_v16 = vsub.f32 %v1848_v6, %v1860_v24  ;;  %v1863_v17 = vmul.f32 %v1861_v12, %v1861_v12 }
0x129c   :  { %v1865_v18 = vsel %vm71_vm0, %v1863_v17, 0.0  ;;  %v1864_v13 = vmul.f32 %v1862_v16, %v1862_v16 }
0x129d   :  { %1866 = vadd.xlane.f32.xlu0 %v1865_v18 }
0x129e   :  { %v1868_v19 = vsel %vm71_vm0, %v1864_v13, 0.0 }
0x12a1   :  { %1869 = vadd.xlane.f32.xlu0 %v1868_v19 }
0x132a   :  { %v1867_v21 = vpop.xlane.xlu0 %1866 }
0x132b   :  { %v1871_v22 = vmul.f32 0.03125, %v1867_v21 }
0x132d   :  { %v1873_v23 = vadd.f32 1e-12, %v1871_v22 }
0x132e   :  { %v1870_v25 = vpop.xlane.xlu0 %1869 }
0x132f   :  { %2740 = vrsqrt.f32 %v1873_v23  ;;  %v1872_v26 = vmul.f32 0.03125, %v1870_v25 }
0x1331   :  { %v1874_v27 = vadd.f32 1e-12, %v1872_v26 }
0x1333   :  { %2742 = vrsqrt.f32 %v1874_v27  ;;  %v2656_v27 = vld [vmem:[%s3348_s16] sm:$0xff]  }
0x1339   :  { %v2741_v5 = vpop.eup %2740 }
0x133a   :  { %v1877_v28 = vmul.f32 %v2741_v5, %v1861_v12  ;;  %v2657_v5 = vld [vmem:[%s3348_s16 + $0x8] sm:$0xff]  }
0x133c   :  { %v1885_v30 = vmul.f32 %v2332_v29, %v1877_v28 }
0x133d   :  { %v2743_v10 = vpop.eup %2742 }
0x133e   :  { %v1878_v33 = vmul.f32 %v2743_v10, %v1862_v16  ;;  %v1893_v36 = vadd.f32 %v2333_v34, %v1885_v30 }
0x1340   :  { %v1886_v35 = vmul.f32 %v2332_v29, %v1878_v33 }
0x1342   :  { %v1894_v37 = vadd.f32 %v2333_v34, %v1886_v35 }
0x1344   :  { %v1900_v38 = vpack.c.bf16 %v1894_v37, %v1893_v36 }
0x1346   :  { %2589 = vmatmul.mubr.msk.bf16.vlgmr.msra.gmra.mrb[40].mxu0 %vm71_vm0, %v1900_v38  ;;  %v2360_v38 = vld [vmem:[%s3346_s14 + $0x1] ss:$0 sm:$0xff] }
0x1347   :  { %2608 = vmatprep.mubr.msk.bf16.mxu0 %vm2779_vm1, %v2778_v15  ;;  %2605 = vmatpush3.bf16.msra.mxu0 %v2656_v27 }
0x1348   :  { %2606 = vmatprep.subr.bf16.mxu0 %v2778_v15 }
0x134b   :  { %2607 = vmatpush3.bf16.msra.mxu0 %v2657_v5 }
0x134c   :  { %2612 = vmatprep.subr.bf16.mxu0 %v2778_v15 }
0x1419   :  { %v1958_v44 = vpop.f32.mrb[40].mxu0 }
0x141a   :  { %v1959_v45 = vadd.f32 %v2339_v41, %v1958_v44  ;;  %v2590_v46 = vpop.f32.mrb[41].mxu0 }
0x141b   :  { %v1961_v47 = vpop.f32.mrb[42].mxu0 }
0x141c   :  { %v1965_v48 = vmul.f32 %v1959_v45, %v1959_v45  ;;  %v1962_v49 = vadd.f32 %v2339_v41, %v1961_v47  ;;  %v2591_v50 = vpop.f32.mrb[43].mxu0 }
0x141d   :  { %v2362_v50 = vld [vmem:[%s3349_s17] ss:$0 sm:$0xff] }
0x141e   :  { %v1967_v31 = vmul.f32 %v1965_v48, %v1959_v45  ;;  %v1966_v32 = vmul.f32 %v1962_v49, %v1962_v49  ;;  %v2658_v48 = vld [vmem:[%s3350_s18] sm:$0xff]  }
0x1420   :  { %v1969_v51 = vmul.f32 0.044715, %v1967_v31  ;;  %v1968_v52 = vmul.f32 %v1966_v32, %v1962_v49 }
0x1422   :  { %v1971_v53 = vadd.f32 %v1969_v51, %v1959_v45  ;;  %v1970_v54 = vmul.f32 0.044715, %v1968_v52 }
0x1424   :  { %v1973_v55 = vmul.f32 0.7978846, %v1971_v53  ;;  %v1972_v56 = vadd.f32 %v1970_v54, %v1962_v49 }
0x1426   :  { %2744 = vtanh.f32 %v1973_v55  ;;  %v1974_v57 = vmul.f32 0.7978846, %v1972_v56 }
0x1428   :  { %2746 = vtanh.f32 %v1974_v57 }
0x1430   :  { %v2745_v58 = vpop.eup %2744 }
0x1431   :  { %v1977_v59 = vadd.f32 1.0, %v2745_v58 }
0x1432   :  { %v2747_v60 = vpop.eup %2746 }
0x1433   :  { %v1979_v61 = vmul.f32 0.5, %v1977_v59  ;;  %v1978_v62 = vadd.f32 1.0, %v2747_v60 }
0x1435   :  { %v1980_v63 = vmul.f32 0.5, %v1978_v62  ;;  %v1981_v0 = vmul.f32 %v1979_v61, %v1959_v45 }
0x1437   :  { %v1982_v1 = vmul.f32 %v1980_v63, %v1962_v49  ;;  %v2659_v49 = vld [vmem:[%s3350_s18 + $0x8] sm:$0xff]   ;;  %s2793_s18 = smov [#allocation3]  }
0x1438   :  { %s2264_s5 = sshll.u32 %s2793_s18, 4  ;;  %s2265_s5 = int_to_ptr.vmem [resolvable:$true] %s2264_s5 }
0x1439   :  { %v1992_v2 = vpack.c.bf16 %v1982_v1, %v1981_v0  ;;  %s2754_s17 = scalar_lea.vmem %s2265_s5, 32  ;;  %p2759_p1 = scmp.lt.s32.totalorder %s2265_s5, %s2265_s5 }
0x143a   :  { %p2755_p0 = scmp.ne.s32.totalorder %s2265_s5, %s2754_s17  ;;  %p2760_p2 = scmp.lt.s32.totalorder %s2754_s17, %s2754_s17 }
0x143b   :  { %2601 = vmatmul.mubr.msk.bf16.vlgmr.msra.gmra.mrb[48].mxu1 %vm1044_vm4, %v1992_v2 }
0x143c   :  { %p2761_p3 = por %p2760_p2, %p2759_p1 }
0x143e   :  { %p2762_p4 = pnand %p2761_p3, %p2755_p0 }
0x150e   :  { %v2062_v4 = vpop.f32.mrb[48].mxu1 }
0x150f   :  { %v2063_v6 = vadd.f32 %v2352_v3, %v2062_v4  ;;  %v2602_v7 = vpop.f32.mrb[49].mxu1 }
0x1510   :  { %v2065_v8 = vpop.f32.mrb[50].mxu1 }
0x1511   :  { %v2066_v9 = vadd.f32 %v2352_v3, %v2065_v8  ;;  %v2603_v11 = vpop.f32.mrb[51].mxu1  ;;  %v2069_v12 = vadd.f32 %v2063_v6, %v1893_v36 }
0x1513   :  { %v2070_v24 = vadd.f32 %v2066_v9, %v1894_v37  ;;  %v2075_v16 = vsel %vm71_vm0, %v2069_v12, 0.0 }
0x1514   :  { %2076 = vadd.xlane.f32.xlu1 %v2075_v16 }
0x1515   :  { %v2078_v17 = vsel %vm71_vm0, %v2070_v24, 0.0 }
0x1516   :  { %2079 = vadd.xlane.f32.xlu0 %v2078_v17 }
0x15a1   :  { %v2077_v18 = vpop.xlane.xlu1 %2076 }
0x15a2   :  { %v2081_v13 = vmul.f32 0.03125, %v2077_v18 }
0x15a3   :  { %v2080_v19 = vpop.xlane.xlu0 %2079 }
0x15a4   :  { %v2083_v14 = vsub.f32 %v2069_v12, %v2081_v13  ;;  %v2082_v20 = vmul.f32 0.03125, %v2080_v19 }
0x15a6   :  { %v2084_v21 = vsub.f32 %v2070_v24, %v2082_v20  ;;  %v2085_v22 = vmul.f32 %v2083_v14, %v2083_v14 }
0x15a8   :  { %v2087_v23 = vsel %vm71_vm0, %v2085_v22, 0.0  ;;  %v2086_v25 = vmul.f32 %v2084_v21, %v2084_v21 }
0x15a9   :  { %2088 = vadd.xlane.f32.xlu1 %v2087_v23 }
0x15aa   :  { %v2090_v26 = vsel %vm71_vm0, %v2086_v25, 0.0 }
0x15ab   :  { %2091 = vadd.xlane.f32.xlu0 %v2090_v26 }
0x1636   :  { %v2089_v28 = vpop.xlane.xlu1 %2088 }
0x1637   :  { %v2093_v29 = vmul.f32 0.03125, %v2089_v28 }
0x1638   :  { %v2092_v10 = vpop.xlane.xlu0 %2091 }
0x1639   :  { %v2095_v30 = vadd.f32 1e-12, %v2093_v29  ;;  %v2094_v33 = vmul.f32 0.03125, %v2092_v10 }
0x163b   :  { %2748 = vrsqrt.f32 %v2095_v30  ;;  %v2096_v34 = vadd.f32 1e-12, %v2094_v33 }
0x163d   :  { %2750 = vrsqrt.f32 %v2096_v34 }
0x1645   :  { %v2749_v35 = vpop.eup %2748 }
0x1646   :  { %v2099_v36 = vmul.f32 %v2749_v35, %v2083_v14 }
0x1647   :  { %v2751_v37 = vpop.eup %2750 }
0x1648   :  { %v2100_v39 = vmul.f32 %v2751_v37, %v2084_v21  ;;  %v2107_v40 = vmul.f32 %v2360_v38, %v2099_v36 }
0x164a   :  { %v2108_v42 = vmul.f32 %v2360_v38, %v2100_v39  ;;  %v2115_v44 = vadd.f32 %v2361_v43, %v2107_v40 }
0x164c   :  { %v2116_v41 = vadd.f32 %v2361_v43, %v2108_v42 }
0x164e   :  { %v2118_v45 = vrot.slane %v2116_v41, 7 }
0x1650   :  { %v2121_v46 = vsel %vm2120_vm2, %v2115_v44, %v2118_v45 }
0x1651   :  { %v2126_v47 = vpack.c.bf16 %v2121_v46, %v2121_v46 }
0x1653   :  { %2609 = vmatmul.mubr.msk.bf16.vlgmr.msra.gmra.mrb[44].mxu0 %vm71_vm0, %v2126_v47 }
0x1654   :  { %2616 = vmatprep.mubr.msk.bf16.mxu0 %vm2779_vm1, %v2778_v15  ;;  %2613 = vmatpush3.bf16.msra.mxu0 %v2658_v48 }
0x1655   :  { %2614 = vmatprep.subr.bf16.mxu0 %v2778_v15  ;;  %v2366_v15 = vld [vmem:[%s3351_s19] ss:$0 sm:$0xff] }
0x1658   :  { %2615 = vmatpush3.bf16.msra.mxu0 %v2659_v49 }
0x1726   :  { %v2183_v31 = vpop.f32.mrb[44].mxu0 }
0x1727   :  { %v2184_v32 = vadd.f32 %v2362_v50, %v2183_v31  ;;  %v2610_v51 = vpop.f32.mrb[45].mxu0 }
0x1728   :  { %v2186_v52 = vpop.f32.mrb[46].mxu0 }
0x1729   :  { %2752 = vtanh.f32 %v2184_v32  ;;  %v2611_v53 = vpop.f32.mrb[47].mxu0 }
0x1733   :  { %v2753_v54 = vpop.eup %2752 }
0x1734   :  { %v2194_v55 = vpack.c.bf16 %v2753_v54, %v2753_v54 }
0x1736   :  { %2617 = vmatmul.mubr.msk.bf16.vlgmr.msra.gmra.mrb[48].mxu0 %vm71_vm0, %v2194_v55 }
0x1809   :  { %v2251_v56 = vpop.f32.mrb[48].mxu0 }
0x180a   :  { %v2252_v57 = vadd.f32 %v2366_v15, %v2251_v56  ;;  %v2618_v58 = vpop.f32.mrb[49].mxu0 }
0x180b   :  { %v2254_v59 = vpop.f32.mrb[50].mxu0 }
0x180c   :  { %2257 = vst [vmem:[#allocation3] sm:$0x3] %v2252_v57  ;;  %v2619_v60 = vpop.f32.mrb[51].mxu0 }
0x180d   :  { %2765 = shalt.err (!%p2762_p4)
}
0x180e   :  { %s2766_s19 = scalar_lea.hbm %s3352_s20, 32 }
0x180f   :  { %p2767_p5 = scmp.ne.s32.totalorder %s3352_s20, %s2766_s19  ;;  %p2770_p6 = scmp.lt.u32.totalorder %s2766_s19, %s3352_s20 }
0x1811   :  { %p2772_p7 = pnand %p2770_p6, %p2767_p5 }
0x1813   :  { %2775 = shalt.err (!%p2772_p7)
}
0x1814   :  { %2267 = dma.vmem_to_hbm [thread:$0]  %s2265_s5, 32, %s3352_s20, [#allocation4]  }
0x1815   :  { %2776 = dma.done.wait [#allocation4], 32  }
0x1816   :  { %2777 = vsyncadd [#allocation4], 4294967264 }
0x1817   :  { %2271 = vsyncpa [#allocation4], 1 }

</bundles_post_ra>
